<compile_context>
chip_gen: v5e
topology: v5e:2x2
jax: 0.10.0
libtpu: 0.0.40
codegen_flags: <defaults>
</compile_context>

<pallas_src>
import functools
import math

import jax
import jax.numpy as jnp
from jax.experimental import pallas as pl
from jax.experimental.pallas import tpu as pltpu


# ---------------------------------------------------------------------------
# Kernel: one grid step == TB scenes x CH descriptions.
# ---------------------------------------------------------------------------
def match_kernel(feat_ref, mask_ref, lang_ref, w1d_ref, w1l_ref, w2_ref,
                 w3_ref, w4_ref, vecs_ref, o_ref, *, bf16_epilogue):
    # feat_ref : (TB, Kp, M)      f32   proposal (detector) features
    # mask_ref : (TB, 1, Kp, 1)   f32   objectness mask
    # lang_ref : (TB, CH, L)      f32   raw language embeddings (per description)
    # w1d_ref  : (M, H)           bf16  det half of folded conv1 weight
    # w1l_ref  : (L, H)           bf16  lang half of folded conv1 weight
    # w2/3/4   : (H, H)           bf16  folded 1x1 conv weights
    # vecs_ref : (7, H)           f32   [b1', prelu_a, b2, b3, b4', w5', c5/H]
    # o_ref    : (TB, 1, CH*Kp)   f32   confidences (lane-dense)
    TB, Kp, M = feat_ref.shape
    CH, L = lang_ref.shape[1], lang_ref.shape[2]
    H = w1d_ref.shape[1]
    R = TB * CH * Kp

    b1 = vecs_ref[0:1, :]
    a_pr = vecs_ref[1:2, :]
    b2 = vecs_ref[2:3, :]
    b3 = vecs_ref[3:4, :]
    b4 = vecs_ref[4:5, :]
    w5 = vecs_ref[5:6, :]
    c5 = vecs_ref[6:7, :]                                     # c5_total / H per lane

    # ---- fuse conv1: det term + lang term (mask commutes with the k=1 conv) ----
    feats = feat_ref[...].astype(jnp.bfloat16).reshape(TB * Kp, M)
    fh = jnp.dot(feats, w1d_ref[...],
                 preferred_element_type=jnp.float32).reshape(TB, 1, Kp, H)

    lang = lang_ref[...].astype(jnp.bfloat16).reshape(TB * CH, L)
    lh = jnp.dot(lang, w1l_ref[...],
                 preferred_element_type=jnp.float32).reshape(TB, CH, 1, H)

    msk = mask_ref[...]                                       # (TB, 1, Kp, 1)

    u = msk * (fh + lh) + b1                                  # (TB, CH, Kp, H) f32
    v = jnp.maximum(u, 0.0) + a_pr * jnp.minimum(u, 0.0)      # PReLU (per-channel)
    v = v.reshape(R, H).astype(jnp.bfloat16)

    # ---- fuse conv2 + match: Conv->ReLU->(BN in W4/b4)->Conv->ReLU->(BN in w5/c5) ----
    if bf16_epilogue:
        # v6e/v7x: bf16 VALU — cast once, bias+ReLU in bf16 (halves VPU element-ops).
        b2b, b3b, b4b = (b2.astype(jnp.bfloat16), b3.astype(jnp.bfloat16),
                         b4.astype(jnp.bfloat16))
        h = jnp.dot(v, w2_ref[...],
                    preferred_element_type=jnp.float32).astype(jnp.bfloat16) + b2b
        p = jnp.maximum(
            jnp.dot(h, w3_ref[...],
                    preferred_element_type=jnp.float32).astype(jnp.bfloat16) + b3b, 0)
        q = jnp.maximum(
            jnp.dot(p, w4_ref[...],
                    preferred_element_type=jnp.float32).astype(jnp.bfloat16) + b4b, 0)
    else:
        # v5e (no bf16 VALU, MXU-bound): keep f32 epilogues.
        h = (jnp.dot(v, w2_ref[...], preferred_element_type=jnp.float32)
             + b2).astype(jnp.bfloat16)
        p = jnp.maximum(
            jnp.dot(h, w3_ref[...], preferred_element_type=jnp.float32) + b3,
            0.0).astype(jnp.bfloat16)
        q = jnp.maximum(
            jnp.dot(p, w4_ref[...], preferred_element_type=jnp.float32) + b4,
            0.0).astype(jnp.bfloat16)

    # Final 1-channel conv + folded BN: scores = sum(q * w5') + c5  (f32).
    scores = jnp.sum(q * w5 + c5, axis=-1)                    # (R,) f32
    o_ref[...] = scores.reshape(TB, 1, CH * Kp).astype(o_ref.dtype)


# ---------------------------------------------------------------------------
# Generation-aware planning helpers.
# ---------------------------------------------------------------------------
def _tpu_plan():
    """Returns (vmem_limit_bytes, vmem_budget_bytes, bf16_epilogue)."""
    kind = ""
    try:
        kind = jax.devices()[0].device_kind.lower()
    except Exception:
        pass
    if any(t in kind for t in ("v5", "v6")):
        limit = 96 << 20          # v5e / v6e: 128 MiB physical VMEM
    else:
        limit = 40 << 20          # conservative default — fits v7x's 64 MiB physical
    budget = int(limit * 0.7)     # headroom for compiler scratch / double buffers
    legacy = any(t in kind for t in ("v2", "v3", "v4", "v5"))
    return limit, budget, (not legacy)


def _auto_block_scenes(B, CH, Kp, M, L, H, budget_bytes):
    """Scenes per grid step: big enough to saturate the MXU, VMEM-safe, >=2 steps."""
    fixed = 2 * ((M + L + 3 * H) * H * 2 + 7 * H * 4)        # double-buffered weights
    per_scene = (2 * Kp * M * 4                              # feats block (f32, 2 bufs)
                 + 2 * CH * L * 4                            # lang block
                 + 2 * Kp * 4                                # mask block
                 + 2 * CH * Kp * 4                           # output block
                 + 6 * CH * Kp * H * 4)                      # live intermediates (f32)
    cap = max(1, (budget_bytes - fixed) // per_scene)
    tb = max(1, -(-1024 // Kp))          # >=1024 rows into every MXU matmul
    tb = min(tb, cap)
    if B >= 2:                           # keep >=2 grid steps (both v7x TCs busy)
        tb = min(tb, -(-B // 2))
    tb = max(1, min(tb, B))
    if tb >= 4:
        tb -= tb % 4                     # TB*K multiples of 256 -> full MXU passes
    return tb


# ---------------------------------------------------------------------------
# Wrapper: layout padding only; projection + all compute fused into the kernel.
# ---------------------------------------------------------------------------
@functools.partial(jax.jit, static_argnames=("chunk_size", "block_scenes"))
def match_module_forward(proposal_feats, proposal_mask, lang_emb, kparams,
                         chunk_size, block_scenes=None):
    B, K, M = proposal_feats.shape
    N, L = lang_emb.shape
    CH = chunk_size
    H = kparams["W2"].shape[-1]
    assert N == B * CH

    vmem_limit, vmem_budget, bf16_epi = _tpu_plan()

    # Lane-dense output for any config: pad K so CH*K_pad % 128 == 0 (and K_pad % 8 == 0).
    step = 128 // math.gcd(128, CH)
    step = step * 8 // math.gcd(step, 8)
    K_pad = -(-K // step) * step

    feats = proposal_feats.astype(jnp.float32)        # stays f32; bf16 cast in-kernel
    mask = proposal_mask.astype(jnp.float32)
    lang = lang_emb.astype(jnp.float32).reshape(B, CH, L)
    if K_pad != K:
        feats = jnp.pad(feats, ((0, 0), (0, K_pad - K), (0, 0)))
        mask = jnp.pad(mask, ((0, 0), (0, K_pad - K)))
    mask = mask.reshape(B, 1, K_pad, 1)

    if block_scenes is None:
        TB = _auto_block_scenes(B, CH, K_pad, M, L, H, vmem_budget)
    else:
        TB = max(1, min(block_scenes, B))
    B_pad = -(-B // TB) * TB
    if B_pad != B:
        pad = B_pad - B
        feats = jnp.pad(feats, ((0, pad), (0, 0), (0, 0)))
        mask = jnp.pad(mask, ((0, pad), (0, 0), (0, 0), (0, 0)))
        lang = jnp.pad(lang, ((0, pad), (0, 0), (0, 0)))

    flops = (2 * B_pad * K_pad * M * H               # det projection
             + 2 * B_pad * CH * L * H                # lang projection
             + 6 * B_pad * CH * K_pad * H * H        # three HxH matmuls
             + 2 * B_pad * CH * K_pad * H)           # final dot
    bytes_accessed = (B_pad * K_pad * M * 4 + B_pad * CH * L * 4
                      + B_pad * K_pad * 4 + B_pad * CH * K_pad * 4
                      + (M + L + 3 * H) * H * 2 + 7 * H * 4)

    out = pl.pallas_call(
        functools.partial(match_kernel, bf16_epilogue=bf16_epi),
        out_shape=jax.ShapeDtypeStruct((B_pad, 1, CH * K_pad), jnp.float32),
        grid_spec=pltpu.PrefetchScalarGridSpec(
            num_scalar_prefetch=0,
            grid=(B_pad // TB,),
            in_specs=[
                pl.BlockSpec((TB, K_pad, M), lambda n: (n, 0, 0)),
                pl.BlockSpec((TB, 1, K_pad, 1), lambda n: (n, 0, 0, 0)),
                pl.BlockSpec((TB, CH, L), lambda n: (n, 0, 0)),
                pl.BlockSpec((M, H), lambda n: (0, 0)),
                pl.BlockSpec((L, H), lambda n: (0, 0)),
                pl.BlockSpec((H, H), lambda n: (0, 0)),
                pl.BlockSpec((H, H), lambda n: (0, 0)),
                pl.BlockSpec((H, H), lambda n: (0, 0)),
                pl.BlockSpec((7, H), lambda n: (0, 0)),
            ],
            out_specs=pl.BlockSpec((TB, 1, CH * K_pad), lambda n: (n, 0, 0)),
        ),
        compiler_params=pltpu.CompilerParams(
            dimension_semantics=("parallel",),
            vmem_limit_bytes=vmem_limit),
        cost_estimate=pl.CostEstimate(flops=flops, transcendentals=0,
                                      bytes_accessed=bytes_accessed),
    )(feats, mask, lang, kparams["W1_det"], kparams["W1_lang"], kparams["W2"],
      kparams["W3"], kparams["W4"], kparams["vecs"])

    # (B_pad, 1, CH*K_pad) -> (N, K)   (cluster_ref)
    return out.reshape(B_pad, CH, K_pad)[:B, :, :K].reshape(N, K)


# ---------------------------------------------------------------------------
# Parameter construction (raw, torch-like) and kernel-side folding.
# ---------------------------------------------------------------------------
def make_params(key, det_channel, lang_size, hidden):
    C_in = det_channel + lang_size
    ks = jax.random.split(key, 16)
    u = lambda k, shape, s=0.1: jax.random.normal(k, shape, jnp.float32) * s

    def bn_params(k):
        kg, kb, km, kv = jax.random.split(k, 4)
        return dict(gamma=1.0 + u(kg, (hidden,), 0.05),
                    beta=u(kb, (hidden,), 0.05),
                    mean=u(km, (hidden,), 0.05),
                    var=1.0 + jnp.abs(u(kv, (hidden,), 0.05)))

    return dict(
        W1=u(ks[0], (C_in, hidden)), b1=u(ks[1], (hidden,)),
        W2=u(ks[2], (hidden, hidden)), b2=u(ks[3], (hidden,)),
        W3=u(ks[4], (hidden, hidden)), b3=u(ks[5], (hidden,)),
        W4=u(ks[6], (hidden, hidden)), b4=u(ks[7], (hidden,)),
        w5=u(ks[8], (hidden,)), b5=u(ks[9], (1,))[0],
        a=jnp.full((hidden,), 0.25, jnp.float32) + u(ks[10], (hidden,), 0.01),
        bn1=bn_params(ks[11]), bn2=bn_params(ks[12]), bn3=bn_params(ks[13]))


def prepare_kernel_params(raw, det_channel, eps=1e-5):
    H = raw["W2"].shape[-1]

    def fold(bn):
        scale = bn["gamma"] / jnp.sqrt(bn["var"] + eps)
        return scale, bn["beta"] - bn["mean"] * scale

    s1, t1 = fold(raw["bn1"])        # BN after fuse conv1
    sA, tA = fold(raw["bn2"])        # BN after first match ReLU
    sB, tB = fold(raw["bn3"])        # BN after second match ReLU

    W1f = raw["W1"] * s1[None, :]                 # (x@W1+b1)*s1+t1 == x@W1f + b1f
    b1f = raw["b1"] * s1 + t1
    W4f = sA[:, None] * raw["W4"]                 # (p*sA+tA)@W4+b4 == p@W4f + b4f
    b4f = raw["b4"] + tA @ raw["W4"]
    w5f = sB * raw["w5"]                          # sum((q*sB+tB)*w5)+b5 == sum(q*w5f)+c5
    c5 = jnp.sum(tB * raw["w5"]) + raw["b5"]
    c5_row = jnp.full((H,), 1.0, jnp.float32) * (c5 / H)   # scalar spread over lanes

    vecs = jnp.stack([b1f, raw["a"], raw["b2"], raw["b3"], b4f, w5f, c5_row], axis=0)
    return dict(
        W1_det=W1f[:det_channel].astype(jnp.bfloat16),
        W1_lang=W1f[det_channel:].astype(jnp.bfloat16),
        W2=raw["W2"].astype(jnp.bfloat16),
        W3=raw["W3"].astype(jnp.bfloat16),
        W4=W4f.astype(jnp.bfloat16),
        vecs=vecs.astype(jnp.float32))


# ---------------------------------------------------------------------------
# Pure-JAX reference (unfolded, f32 HIGHEST precision) == torch eval forward.
# ---------------------------------------------------------------------------
def reference_forward(proposal_feats, proposal_mask, lang_emb, raw, chunk_size):
    B, K, M = proposal_feats.shape
    N, L = lang_emb.shape
    feat = jnp.broadcast_to(proposal_feats[:, None], (B, chunk_size, K, M)
                            ).reshape(N, K, M)
    msk = jnp.broadcast_to(proposal_mask[:, None, :, None],
                           (B, chunk_size, K, 1)).reshape(N, K, 1)
    lang = jnp.broadcast_to(lang_emb[:, None, :], (N, K, L))
    x = jnp.concatenate([feat, lang], -1) * msk
    hp = jax.lax.Precision.HIGHEST

    def bn(v, p):
        return (v - p["mean"]) / jnp.sqrt(p["var"] + 1e-5) * p["gamma"] + p["beta"]

    u = bn(jnp.dot(x, raw["W1"], precision=hp) + raw["b1"], raw["bn1"])
    v = jnp.maximum(u, 0.0) + raw["a"] * jnp.minimum(u, 0.0)
    h = jnp.dot(v, raw["W2"], precision=hp) + raw["b2"]
    p = bn(jnp.maximum(jnp.dot(h, raw["W3"], precision=hp) + raw["b3"], 0.0), raw["bn2"])
    q = bn(jnp.maximum(jnp.dot(p, raw["W4"], precision=hp) + raw["b4"], 0.0), raw["bn3"])
    return jnp.dot(q, raw["w5"], precision=hp) + raw["b5"]      # (N, K)


if __name__ == "__main__":
    # cfg-derived sizes (small, consistent with the module):
    B = 2                 # batch of scenes
    NUM_PROPOSALS = 64    # cfg.model.max_num_proposal
    DET_CHANNEL = 128     # cfg.model.m
    CHUNK_SIZE = 2        # cfg.data.num_des_per_scene
    LANG_SIZE = 256
    HIDDEN = 128

    key = jax.random.PRNGKey(0)
    k_feat, k_mask, k_lang, k_par = jax.random.split(key, 4)

    proposal_feats = jax.random.normal(
        k_feat, (B, NUM_PROPOSALS, DET_CHANNEL), jnp.float32) * 0.1
    proposal_mask = (jax.random.uniform(k_mask, (B, NUM_PROPOSALS)) > 0.3
                     ).astype(jnp.float32)
    lang_emb = jax.random.normal(
        k_lang, (B * CHUNK_SIZE, LANG_SIZE), jnp.float32) * 0.1

    raw_params = make_params(k_par, DET_CHANNEL, LANG_SIZE, HIDDEN)
    kparams = prepare_kernel_params(raw_params, DET_CHANNEL)

    out = match_module_forward(proposal_feats, proposal_mask, lang_emb, kparams,
                               chunk_size=CHUNK_SIZE)
    out = jax.block_until_ready(out)

    ref = reference_forward(proposal_feats, proposal_mask, lang_emb, raw_params,
                            CHUNK_SIZE)
    assert out.shape == (B * CHUNK_SIZE, NUM_PROPOSALS)
    max_err = float(jnp.max(jnp.abs(out - ref)))
    assert jnp.allclose(out, ref, rtol=2e-2, atol=2e-2), max_err
    print("KERNEL_OK")
</pallas_src>

<mosaic_0001>
module attributes {stable_mosaic.version = 11 : i64} {
  func.func @match_kernel(%arg0: i32, %arg1: memref<1x64x128xf32, #tpu.memory_space<vmem>>, %arg2: memref<1x1x64x1xf32, #tpu.memory_space<vmem>>, %arg3: memref<1x2x256xf32, #tpu.memory_space<vmem>>, %arg4: memref<128x128xbf16, #tpu.memory_space<vmem>>, %arg5: memref<256x128xbf16, #tpu.memory_space<vmem>>, %arg6: memref<128x128xbf16, #tpu.memory_space<vmem>>, %arg7: memref<128x128xbf16, #tpu.memory_space<vmem>>, %arg8: memref<128x128xbf16, #tpu.memory_space<vmem>>, %arg9: memref<7x128xf32, #tpu.memory_space<vmem>>, %arg10: memref<1x1x128xf32, #tpu.memory_space<vmem>>) attributes {dimension_semantics = [#tpu.dimension_semantics<parallel>], iteration_bounds = array<i64: 2>, scalar_prefetch = 0 : i64, scratch_operands = 0 : i64, tpu.core_type = #tpu.core_type<tc>, window_params = [{transform_indices = @transform_0, window_bounds = array<i64: 1, 64, 128>}, {transform_indices = @transform_1, window_bounds = array<i64: 1, 1, 64, 1>}, {transform_indices = @transform_2, window_bounds = array<i64: 1, 2, 256>}, {pipeline_mode = #tpu.pipeline_mode<synchronous>, transform_indices = @transform_3, window_bounds = array<i64: 128, 128>}, {pipeline_mode = #tpu.pipeline_mode<synchronous>, transform_indices = @transform_4, window_bounds = array<i64: 256, 128>}, {pipeline_mode = #tpu.pipeline_mode<synchronous>, transform_indices = @transform_5, window_bounds = array<i64: 128, 128>}, {pipeline_mode = #tpu.pipeline_mode<synchronous>, transform_indices = @transform_6, window_bounds = array<i64: 128, 128>}, {pipeline_mode = #tpu.pipeline_mode<synchronous>, transform_indices = @transform_7, window_bounds = array<i64: 128, 128>}, {pipeline_mode = #tpu.pipeline_mode<synchronous>, transform_indices = @transform_8, window_bounds = array<i64: 7, 128>}, {transform_indices = @transform_9, window_bounds = array<i64: 1, 1, 128>}]} {
    %c0 = arith.constant 0 : index
    %c0_0 = arith.constant 0 : index
    %0 = vector.load %arg9[%c0, %c0_0] : memref<7x128xf32, #tpu.memory_space<vmem>>, vector<1x128xf32>
    %c1 = arith.constant 1 : index
    %c0_1 = arith.constant 0 : index
    %1 = vector.load %arg9[%c1, %c0_1] : memref<7x128xf32, #tpu.memory_space<vmem>>, vector<1x128xf32>
    %c2 = arith.constant 2 : index
    %c0_2 = arith.constant 0 : index
    %2 = vector.load %arg9[%c2, %c0_2] : memref<7x128xf32, #tpu.memory_space<vmem>>, vector<1x128xf32>
    %c3 = arith.constant 3 : index
    %c0_3 = arith.constant 0 : index
    %3 = vector.load %arg9[%c3, %c0_3] : memref<7x128xf32, #tpu.memory_space<vmem>>, vector<1x128xf32>
    %c4 = arith.constant 4 : index
    %c0_4 = arith.constant 0 : index
    %4 = vector.load %arg9[%c4, %c0_4] : memref<7x128xf32, #tpu.memory_space<vmem>>, vector<1x128xf32>
    %c5 = arith.constant 5 : index
    %c0_5 = arith.constant 0 : index
    %5 = vector.load %arg9[%c5, %c0_5] : memref<7x128xf32, #tpu.memory_space<vmem>>, vector<1x128xf32>
    %c6 = arith.constant 6 : index
    %c0_6 = arith.constant 0 : index
    %6 = vector.load %arg9[%c6, %c0_6] : memref<7x128xf32, #tpu.memory_space<vmem>>, vector<1x128xf32>
    %c0_7 = arith.constant 0 : index
    %c0_8 = arith.constant 0 : index
    %c0_9 = arith.constant 0 : index
    %7 = vector.load %arg1[%c0_7, %c0_8, %c0_9] : memref<1x64x128xf32, #tpu.memory_space<vmem>>, vector<1x64x128xf32>
    %8 = arith.truncf %7 : vector<1x64x128xf32> to vector<1x64x128xbf16>
    %9 = vector.shape_cast %8 : vector<1x64x128xbf16> to vector<64x128xbf16>
    %c0_10 = arith.constant 0 : index
    %c0_11 = arith.constant 0 : index
    %10 = vector.load %arg4[%c0_10, %c0_11] : memref<128x128xbf16, #tpu.memory_space<vmem>>, vector<128x128xbf16>
    %cst = arith.constant dense<0.000000e+00> : vector<64x128xf32>
    %11 = tpu.matmul %9, %10, %cst {dimension_numbers = #tpu.dot_dimension_numbers<[1], [0], [0], [1], [0, 0, 1, 1], [], []>} : vector<64x128xbf16>, vector<128x128xbf16>, vector<64x128xf32> -> vector<64x128xf32>
    %12 = vector.shape_cast %11 : vector<64x128xf32> to vector<1x1x64x128xf32>
    %c0_12 = arith.constant 0 : index
    %c0_13 = arith.constant 0 : index
    %c0_14 = arith.constant 0 : index
    %13 = vector.load %arg3[%c0_12, %c0_13, %c0_14] : memref<1x2x256xf32, #tpu.memory_space<vmem>>, vector<1x2x256xf32>
    %14 = arith.truncf %13 : vector<1x2x256xf32> to vector<1x2x256xbf16>
    %15 = vector.shape_cast %14 : vector<1x2x256xbf16> to vector<2x256xbf16>
    %c0_15 = arith.constant 0 : index
    %c0_16 = arith.constant 0 : index
    %16 = vector.load %arg5[%c0_15, %c0_16] : memref<256x128xbf16, #tpu.memory_space<vmem>>, vector<256x128xbf16>
    %cst_17 = arith.constant dense<0.000000e+00> : vector<2x128xf32>
    %17 = tpu.matmul %15, %16, %cst_17 {dimension_numbers = #tpu.dot_dimension_numbers<[1], [0], [0], [1], [0, 0, 1, 1], [], []>} : vector<2x256xbf16>, vector<256x128xbf16>, vector<2x128xf32> -> vector<2x128xf32>
    %18 = vector.shape_cast %17 : vector<2x128xf32> to vector<1x2x1x128xf32>
    %c0_18 = arith.constant 0 : index
    %c0_19 = arith.constant 0 : index
    %c0_20 = arith.constant 0 : index
    %c0_21 = arith.constant 0 : index
    %19 = vector.load %arg2[%c0_18, %c0_19, %c0_20, %c0_21] : memref<1x1x64x1xf32, #tpu.memory_space<vmem>>, vector<1x1x64x1xf32>
    %20 = vector.broadcast %12 : vector<1x1x64x128xf32> to vector<1x2x64x128xf32>
    %21 = vector.broadcast %18 : vector<1x2x1x128xf32> to vector<1x2x64x128xf32>
    %22 = arith.addf %20, %21 : vector<1x2x64x128xf32>
    %23 = vector.broadcast %19 : vector<1x1x64x1xf32> to vector<1x2x64x128xf32>
    %24 = arith.mulf %23, %22 : vector<1x2x64x128xf32>
    %25 = vector.shape_cast %0 : vector<1x128xf32> to vector<1x1x1x128xf32>
    %26 = vector.broadcast %25 : vector<1x1x1x128xf32> to vector<1x2x64x128xf32>
    %27 = arith.addf %24, %26 : vector<1x2x64x128xf32>
    %cst_22 = arith.constant 0.000000e+00 : f32
    %28 = vector.broadcast %cst_22 : f32 to vector<1x2x64x128xf32>
    %29 = arith.maximumf %27, %28 : vector<1x2x64x128xf32>
    %cst_23 = arith.constant 0.000000e+00 : f32
    %30 = vector.broadcast %cst_23 : f32 to vector<1x2x64x128xf32>
    %31 = arith.minimumf %27, %30 : vector<1x2x64x128xf32>
    %32 = vector.shape_cast %1 : vector<1x128xf32> to vector<1x1x1x128xf32>
    %33 = vector.broadcast %32 : vector<1x1x1x128xf32> to vector<1x2x64x128xf32>
    %34 = arith.mulf %33, %31 : vector<1x2x64x128xf32>
    %35 = arith.addf %29, %34 : vector<1x2x64x128xf32>
    %36 = vector.shape_cast %35 : vector<1x2x64x128xf32> to vector<128x128xf32>
    %37 = arith.truncf %36 : vector<128x128xf32> to vector<128x128xbf16>
    %38 = arith.truncf %2 : vector<1x128xf32> to vector<1x128xbf16>
    %39 = arith.truncf %3 : vector<1x128xf32> to vector<1x128xbf16>
    %40 = arith.truncf %4 : vector<1x128xf32> to vector<1x128xbf16>
    %c0_24 = arith.constant 0 : index
    %c0_25 = arith.constant 0 : index
    %41 = vector.load %arg6[%c0_24, %c0_25] : memref<128x128xbf16, #tpu.memory_space<vmem>>, vector<128x128xbf16>
    %cst_26 = arith.constant dense<0.000000e+00> : vector<128x128xf32>
    %42 = tpu.matmul %37, %41, %cst_26 {dimension_numbers = #tpu.dot_dimension_numbers<[1], [0], [0], [1], [0, 0, 1, 1], [], []>} : vector<128x128xbf16>, vector<128x128xbf16>, vector<128x128xf32> -> vector<128x128xf32>
    %43 = arith.truncf %42 : vector<128x128xf32> to vector<128x128xbf16>
    %44 = vector.broadcast %38 : vector<1x128xbf16> to vector<128x128xbf16>
    %45 = arith.addf %43, %44 : vector<128x128xbf16>
    %c0_27 = arith.constant 0 : index
    %c0_28 = arith.constant 0 : index
    %46 = vector.load %arg7[%c0_27, %c0_28] : memref<128x128xbf16, #tpu.memory_space<vmem>>, vector<128x128xbf16>
    %cst_29 = arith.constant dense<0.000000e+00> : vector<128x128xf32>
    %47 = tpu.matmul %45, %46, %cst_29 {dimension_numbers = #tpu.dot_dimension_numbers<[1], [0], [0], [1], [0, 0, 1, 1], [], []>} : vector<128x128xbf16>, vector<128x128xbf16>, vector<128x128xf32> -> vector<128x128xf32>
    %48 = arith.truncf %47 : vector<128x128xf32> to vector<128x128xbf16>
    %49 = vector.broadcast %39 : vector<1x128xbf16> to vector<128x128xbf16>
    %50 = arith.addf %48, %49 : vector<128x128xbf16>
    %cst_30 = arith.constant 0.000000e+00 : bf16
    %51 = vector.broadcast %cst_30 : bf16 to vector<128x128xbf16>
    %52 = arith.maximumf %50, %51 : vector<128x128xbf16>
    %c0_31 = arith.constant 0 : index
    %c0_32 = arith.constant 0 : index
    %53 = vector.load %arg8[%c0_31, %c0_32] : memref<128x128xbf16, #tpu.memory_space<vmem>>, vector<128x128xbf16>
    %cst_33 = arith.constant dense<0.000000e+00> : vector<128x128xf32>
    %54 = tpu.matmul %52, %53, %cst_33 {dimension_numbers = #tpu.dot_dimension_numbers<[1], [0], [0], [1], [0, 0, 1, 1], [], []>} : vector<128x128xbf16>, vector<128x128xbf16>, vector<128x128xf32> -> vector<128x128xf32>
    %55 = arith.truncf %54 : vector<128x128xf32> to vector<128x128xbf16>
    %56 = vector.broadcast %40 : vector<1x128xbf16> to vector<128x128xbf16>
    %57 = arith.addf %55, %56 : vector<128x128xbf16>
    %cst_34 = arith.constant 0.000000e+00 : bf16
    %58 = vector.broadcast %cst_34 : bf16 to vector<128x128xbf16>
    %59 = arith.maximumf %57, %58 : vector<128x128xbf16>
    %60 = arith.extf %59 : vector<128x128xbf16> to vector<128x128xf32>
    %61 = vector.broadcast %5 : vector<1x128xf32> to vector<128x128xf32>
    %62 = arith.mulf %60, %61 : vector<128x128xf32>
    %63 = vector.broadcast %6 : vector<1x128xf32> to vector<128x128xf32>
    %64 = arith.addf %62, %63 : vector<128x128xf32>
    %cst_35 = arith.constant dense<0.000000e+00> : vector<128xf32>
    %65 = vector.multi_reduction <add>, %64, %cst_35 [1] : vector<128x128xf32> to vector<128xf32>
    %66 = vector.shape_cast %65 : vector<128xf32> to vector<1x1x128xf32>
    %c0_36 = arith.constant 0 : index
    %c0_37 = arith.constant 0 : index
    %c0_38 = arith.constant 0 : index
    %67 = vector.load %arg10[%c0_36, %c0_37, %c0_38] : memref<1x1x128xf32, #tpu.memory_space<vmem>>, vector<1x1x128xf32>
    tpu.vector_store %arg10[%c0_36, %c0_37, %c0_38], %66 {strides = array<i32>} : memref<1x1x128xf32, #tpu.memory_space<vmem>>, vector<1x1x128xf32>,
    return
  }
  func.func @transform_0(%arg0: i32) -> (i32, i32, i32) {
    %c0_i32 = arith.constant 0 : i32
    %c0_i32_0 = arith.constant 0 : i32
    %c0_i32_1 = arith.constant 0 : i32
    return %arg0, %c0_i32, %c0_i32_0 : i32, i32, i32
  }
  func.func @transform_1(%arg0: i32) -> (i32, i32, i32, i32) {
    %c0_i32 = arith.constant 0 : i32
    %c0_i32_0 = arith.constant 0 : i32
    %c0_i32_1 = arith.constant 0 : i32
    %c0_i32_2 = arith.constant 0 : i32
    return %arg0, %c0_i32, %c0_i32_0, %c0_i32_1 : i32, i32, i32, i32
  }
  func.func @transform_2(%arg0: i32) -> (i32, i32, i32) {
    %c0_i32 = arith.constant 0 : i32
    %c0_i32_0 = arith.constant 0 : i32
    %c0_i32_1 = arith.constant 0 : i32
    return %arg0, %c0_i32, %c0_i32_0 : i32, i32, i32
  }
  func.func @transform_3(%arg0: i32) -> (i32, i32) {
    %c0_i32 = arith.constant 0 : i32
    %c0_i32_0 = arith.constant 0 : i32
    %c0_i32_1 = arith.constant 0 : i32
    return %c0_i32, %c0_i32_0 : i32, i32
  }
  func.func @transform_4(%arg0: i32) -> (i32, i32) {
    %c0_i32 = arith.constant 0 : i32
    %c0_i32_0 = arith.constant 0 : i32
    %c0_i32_1 = arith.constant 0 : i32
    return %c0_i32, %c0_i32_0 : i32, i32
  }
  func.func @transform_5(%arg0: i32) -> (i32, i32) {
    %c0_i32 = arith.constant 0 : i32
    %c0_i32_0 = arith.constant 0 : i32
    %c0_i32_1 = arith.constant 0 : i32
    return %c0_i32, %c0_i32_0 : i32, i32
  }
  func.func @transform_6(%arg0: i32) -> (i32, i32) {
    %c0_i32 = arith.constant 0 : i32
    %c0_i32_0 = arith.constant 0 : i32
    %c0_i32_1 = arith.constant 0 : i32
    return %c0_i32, %c0_i32_0 : i32, i32
  }
  func.func @transform_7(%arg0: i32) -> (i32, i32) {
    %c0_i32 = arith.constant 0 : i32
    %c0_i32_0 = arith.constant 0 : i32
    %c0_i32_1 = arith.constant 0 : i32
    return %c0_i32, %c0_i32_0 : i32, i32
  }
  func.func @transform_8(%arg0: i32) -> (i32, i32) {
    %c0_i32 = arith.constant 0 : i32
    %c0_i32_0 = arith.constant 0 : i32
    %c0_i32_1 = arith.constant 0 : i32
    return %c0_i32, %c0_i32_0 : i32, i32
  }
  func.func @transform_9(%arg0: i32) -> (i32, i32, i32) {
    %c0_i32 = arith.constant 0 : i32
    %c0_i32_0 = arith.constant 0 : i32
    %c0_i32_1 = arith.constant 0 : i32
    return %arg0, %c0_i32, %c0_i32_0 : i32, i32, i32
  }
}

</mosaic_0001>

<bundles_post_ra>
// kernel: match_module_forward.1
= control target key start
LH: loop header
LB: loop body
LE: loop exit
PB: predicated region body
PF: predicated region fallthrough
CT: control target
= control target key end

     0   :  { %14 = vsyncpa [#allocation3], 0  ;;  %s2747_s0 = inlined_call_operand.vmem [shape: f32[2,64,128], index: 0, kind: input, shape index: {}]   ;;  %s2748_s1 = inlined_call_operand.vmem [shape: f32[2,1,64,1], index: 1, kind: input, shape index: {}]   ;;  %s2749_s2 = inlined_call_operand.vmem [shape: f32[2,2,256], index: 2, kind: input, shape index: {}]   ;;  %s2750_s3 = inlined_call_operand.hbm [shape: bf16[128,128], index: 3, kind: input, shape index: {}]   ;;  %s2751_s4 = inlined_call_operand.hbm [shape: bf16[256,128], index: 4, kind: input, shape index: {}]   ;;  %s2752_s5 = inlined_call_operand.hbm [shape: bf16[128,128], index: 5, kind: input, shape index: {}]   ;;  %s2753_s6 = inlined_call_operand.hbm [shape: bf16[128,128], index: 6, kind: input, shape index: {}]   ;;  %s2754_s7 = inlined_call_operand.hbm [shape: bf16[128,128], index: 7, kind: input, shape index: {}]   ;;  %s2755_s8 = inlined_call_operand.vmem [shape: f32[7,128], index: 8, kind: input, shape index: {}]   ;;  %s2756_s9 = inlined_call_operand.vmem [shape: f32[2,1,128], index: 9, kind: output, shape index: {}]  }
   0x1   :  { %15 = vsyncpa [#allocation5], 0 }
   0x2   :  { %16 = vsyncpa [#allocation8], 0  ;;  %s2413_s30 = smov 0  }
   0x3 LB: > { %s2419_s10 = sadd.s32 4294967295, %s2353_s30   ;;  %p1852_p0 = scmp.ge.s32.totalorder %s2353_s30, 1  ;;  %s2353_s30 = sphi %s2413_s30, %s22_s30  }
   0x4   : > { %p257_p1 = scmp.lt.s32.totalorder %s2353_s30, 3  ;;  %p2152_p2 = scmp.eq.s32.totalorder %s2419_s10, 0 }
   0x5   : > { %s282_s13 = sshll.u32 %s2751_s4, 4  ;;  %s310_s17 = sshll.u32 %s2753_s6, 4  ;;  %s283_s13 = int_to_ptr.hbm [resolvable:$true] %s282_s13  ;;  %s311_s17 = int_to_ptr.hbm [resolvable:$true] %s310_s17 }
   0x6   : > { %p2427_p3 = pnand %p1852_p0, %p257_p1  ;;  %s2355_s18 = smov [#allocation4]  }
   0x7   : > { %s284_s19 = sshll.u32 %s2355_s18, 4  ;;  %s2356_s21 = smov [#allocation7]   ;;  %s285_s19 = int_to_ptr.vmem [resolvable:$true] %s284_s19 }
   0x8   : > { %p2136_p4 = pneg %p2427_p3  ;;  %s312_s22 = sshll.u32 %s2356_s21, 4  ;;  %s313_s22 = int_to_ptr.vmem [resolvable:$true] %s312_s22 }
   0x9   : > { %s268_s25 = sshll.u32 %s2750_s3, 4  ;;  %s2357_s26 = smov 64   ;;  %s269_s25 = int_to_ptr.hbm [resolvable:$true] %s268_s25 }
   0xa   : > { %p2438_p5 = pnand %p2152_p2, %p2136_p4  ;;  %s2358_s27 = smov 4  }
   0xb   : > { %s2359_s28 = smov [#allocation2]   ;;  %s296_s15 = sshll.u32 %s2752_s5, 4  ;;  %s297_s15 = int_to_ptr.hbm [resolvable:$true] %s296_s15 }
   0xc   : > { %2142 = dma.hbm_to_vmem [thread:$0]  (!%p2438_p5), %s283_s13, 2048, %s285_s19, [#allocation5], %s2357_s26, %s2357_s26, %s2358_s27  }
   0xd   : > { %2148 = dma.hbm_to_vmem [thread:$0]  (!%p2438_p5), %s311_s17, 1024, %s313_s22, [#allocation8], %s2357_s26, %s2357_s26, %s2358_s27  }
   0xe   : > { %s270_s29 = sshll.u32 %s2359_s28, 4  ;;  %s324_s21 = sshll.u32 %s2754_s7, 4  ;;  %s271_s29 = int_to_ptr.vmem [resolvable:$true] %s270_s29  ;;  %s325_s21 = int_to_ptr.hbm [resolvable:$true] %s324_s21 }
   0xf   : > { %2139 = dma.hbm_to_vmem [thread:$0]  (!%p2438_p5), %s269_s25, 1024, %s271_s29, [#allocation3], %s2357_s26, %s2357_s26, %s2358_s27  }
  0x10   : > { %s2360_s23 = smov [#allocation6]   ;;  %s2361_s17 = smov [#allocation9]  }
  0x11   : > { %s298_s13 = sshll.u32 %s2360_s23, 4  ;;  %s326_s19 = sshll.u32 %s2361_s17, 4  ;;  %s299_s13 = int_to_ptr.vmem [resolvable:$true] %s298_s13  ;;  %s327_s19 = int_to_ptr.vmem [resolvable:$true] %s326_s19 }
  0x12   : > { %2145 = dma.hbm_to_vmem [thread:$0]  (!%p2438_p5), %s297_s15, 1024, %s299_s13, [#allocation5], %s2357_s26, %s2357_s26, %s2358_s27  }
  0x13   : > { %2151 = dma.hbm_to_vmem [thread:$0]  (!%p2438_p5), %s325_s21, 1024, %s327_s19, [#allocation8], %s2357_s26, %s2357_s26, %s2358_s27  }
  0x14   : > { %369 = sbr.rel (%p2427_p3) target bundleno = 967 (0x3c7), region = 56 }
  0x19   : > { %2340 = dma.done.wait (%p2152_p2), [#allocation3], 1024  }
  0x1a   : > { %2342 = vsyncadd (%p2152_p2), [#allocation3], 4294966272 }
  0x1b   : > { %2344 = dma.done.wait (%p2152_p2), [#allocation5], 3072  }
  0x1c   : > { %2346 = vsyncadd (%p2152_p2), [#allocation5], 4294964224 }
  0x1d   : > { %2348 = dma.done.wait (%p2152_p2), [#allocation8], 2048  }
  0x1e   : > { %2350 = vsyncadd (%p2152_p2), [#allocation8], 4294965248  ;;  %p434_p6 = scmp.lt.s32.totalorder %s2419_s10, 1  ;;  %v2075_v0 = vld [vmem:[#allocation2 + $0x38] sm:$0xff]  ;;  %v2074_v1 = vld [vmem:[#allocation2 + $0x30] sm:$0xff]  ;;  %v2362_v44 = vmov 0  }
  0x1f   : > { %563 = vmatpush.bf16.msra.mxu0 %v2075_v0  ;;  %v2073_v3 = vld [vmem:[#allocation2 + $0x28] sm:$0xff]  ;;  %v2072_v4 = vld [vmem:[#allocation2 + $0x20] sm:$0xff]  ;;  %v2071_v5 = vld [vmem:[#allocation2 + $0x18] sm:$0xff]  ;;  %2178 = vset.pattern.permute.xlu0 %v2362_v44  ;;  %vm1669_vm0 = vcmask 130112   ;;  %vm1673_vm1 = vcmask 195712   ;;  %vm1677_vm2 = vcmask 261312  }
  0x20   : > { %s2760_s10 = smov (!%p434_p6, %s2419_s10), 1  ;;  %v2070_v6 = vld [vmem:[#allocation2 + $0x10] sm:$0xff]  ;;  %v2069_v11 = vld [vmem:[#allocation2 + $0x8] sm:$0xff]  ;;  %v2068_v14 = vld [vmem:[#allocation2] sm:$0xff]  ;;  %2179 = vset.pattern.permute.xlu1 %v2362_v44  ;;  %2180 = vset.pattern.permute.xlu2 %v2362_v44  ;;  %vm1681_vm3 = vcmask 326912   ;;  %vm1685_vm4 = vcmask 392512  }
  0x21   : > { %s2067_s14 = sshll.u32 %s2760_s10, 2  ;;  %s2065_s25 = sshll.u32 %s2760_s10, 6  ;;  %v2083_v15 = vld [vmem:[#allocation4 + $0x38] sm:$0xff]  ;;  %v2082_v17 = vld [vmem:[#allocation4 + $0x30] sm:$0xff]  ;;  %v2081_v20 = vld [vmem:[#allocation4 + $0x28] sm:$0xff]  ;;  %vm1689_vm5 = vcmask 458112  }
  0x22   : > { %s448_s24 = scalar_lea.vmem %s2749_s2, %s2067_s14  ;;  %s2489_s28 = scalar_lea.vmem %s2747_s0, %s2065_s25  ;;  %v2080_v23 = vld [vmem:[#allocation4 + $0x20] sm:$0xff]  ;;  %v2079_v26 = vld [vmem:[#allocation4 + $0x18] sm:$0xff]  ;;  %v2078_v28 = vld [vmem:[#allocation4 + $0x10] sm:$0xff]  ;;  %vm1693_vm6 = vcmask 523712   ;;  %vm1697_vm7 = vcmask 589312   ;;  %vm1701_vm8 = vcmask 654912  }
  0x23   : > { %v592_v2 = vld [vmem:[%s448_s24] sm:$0xf]  ;;  %564 = vmatpush.bf16.msra.mxu0 %v2074_v1  ;;  %v460_v8 = vld [vmem:[%s2489_s28 + $0x8] sm:$0xff]  ;;  %v461_v18 = vld [vmem:[%s2489_s28 + $0x10] sm:$0xff]  ;;  %s2502_s12 = scalar_lea.vmem %s2748_s1, %s2065_s25  ;;  %vm1705_vm9 = vcmask 720512   ;;  %vm1709_vm10 = vcmask 786112   ;;  %s451_s29 = scalar_lea.vmem %s2756_s9, %s2760_s10 }
  0x24   : > { %594 = vst [vmem:[#allocation1] ss:$4 sm:$0xff] %v592_v2  ;;  %v459_v7 = vld [vmem:[%s2489_s28] sm:$0xff]  ;;  %v468_v10 = vpack.c.bf16 %v460_v8, %v460_v8  ;;  %v462_v19 = vld [vmem:[%s2489_s28 + $0x18] sm:$0xff]  ;;  %v469_v21 = vpack.c.bf16 %v461_v18, %v461_v18  ;;  %v464_v30 = vld [vmem:[%s2489_s28 + $0x28] sm:$0xff]  ;;  %vm1713_vm11 = vcmask 851712  }
  0x25   : > { %v467_v9 = vpack.c.bf16 %v459_v7, %v459_v7  ;;  %v470_v22 = vpack.c.bf16 %v462_v19, %v462_v19  ;;  %v463_v29 = vld [vmem:[%s2489_s28 + $0x20] sm:$0xff]  ;;  %v2077_v31 = vld [vmem:[#allocation4 + $0x8] sm:$0xff]  ;;  %v472_v33 = vpack.c.bf16 %v464_v30, %v464_v30  ;;  %v2076_v34 = vld [vmem:[#allocation4] sm:$0xff]  ;;  %vm1717_vm12 = vcmask 917312  }
  0x26   : > { %v500_v13 = vunpack.c.l.b16 %v468_v10  ;;  %v501_v24 = vunpack.c.l.b16 %v469_v21  ;;  %v471_v32 = vpack.c.bf16 %v463_v29, %v463_v29  ;;  %v2091_v35 = vld [vmem:[#allocation4 + $0x78] sm:$0xff]  ;;  %v2090_v38 = vld [vmem:[#allocation4 + $0x70] sm:$0xff]  ;;  %v2089_v40 = vld [vmem:[#allocation4 + $0x68] sm:$0xff]  ;;  %vm1721_vm13 = vcmask 982912  }
  0x27   : > { %565 = vmatpush.bf16.msra.mxu0 %v2073_v3  ;;  %v499_v12 = vunpack.c.l.b16 %v467_v9  ;;  %v502_v25 = vunpack.c.l.b16 %v470_v22  ;;  %v504_v37 = vunpack.c.l.b16 %v472_v33  ;;  %v763_v41 = vld [vmem:[%s2502_s12] sm:$0xff]  ;;  %v465_v42 = vld [vmem:[%s2489_s28 + $0x30] sm:$0xff]  ;;  %v466_v43 = vld [vmem:[%s2489_s28 + $0x38] sm:$0xff]  ;;  %vm1725_vm14 = vcmask 1048512  }
  0x28   : > { %v503_v36 = vunpack.c.l.b16 %v471_v32  ;;  %793 = vperm.xlu0 %2178, %v763_v41   ;;  %v2088_v45 = vld [vmem:[#allocation4 + $0x60] sm:$0xff]  ;;  %v473_v46 = vpack.c.bf16 %v465_v42, %v465_v42  ;;  %v474_v47 = vpack.c.bf16 %v466_v43, %v466_v43  ;;  %v2087_v48 = vld [vmem:[#allocation4 + $0x58] sm:$0xff]  ;;  %v2086_v51 = vld [vmem:[#allocation4 + $0x50] sm:$0xff] }
  0x29   : > { %v507_v16 = vpack.c.b16 %v500_v13, %v499_v12  ;;  %v508_v27 = vpack.c.b16 %v502_v25, %v501_v24  ;;  %v2085_v53 = vld [vmem:[#allocation4 + $0x48] sm:$0xff]  ;;  %v764_v56 = vld [vmem:[%s2502_s12 + $0x8] sm:$0xff]  ;;  %v767_v58 = vld [vmem:[%s2502_s12 + $0x20] sm:$0xff] }
  0x2a   : > { %v509_v39 = vpack.c.b16 %v504_v37, %v503_v36  ;;  %v505_v49 = vunpack.c.l.b16 %v473_v46  ;;  %v506_v50 = vunpack.c.l.b16 %v474_v47  ;;  %v765_v55 = vld [vmem:[%s2502_s12 + $0x10] sm:$0xff]  ;;  %813 = vperm.xlu2 %2180, %v767_v58   ;;  %v2084_v59 = vld [vmem:[#allocation4 + $0x40] sm:$0xff]  ;;  %v766_v61 = vld [vmem:[%s2502_s12 + $0x18] sm:$0xff] }
  0x2b   : > { %566 = vmatpush.bf16.msra.mxu0 %v2072_v4  ;;  %v595_v54 = vld.sshfl [vmem:[#allocation1] sm:$0xff pattern:$0x73625140]  ;;  %v596_v57 = vld.sshfl [vmem:[#allocation1 + $0x8] sm:$0xff pattern:$0x73625140]  ;;  %803 = vperm.xlu1 %2179, %v765_v55  }
  0x2c   : > { %v510_v52 = vpack.c.b16 %v506_v50, %v505_v49  ;;  %v599_v60 = vpack.c.bf16 %v596_v57, %v595_v54  ;;  %v769_v62 = vld [vmem:[%s2502_s12 + $0x30] sm:$0xff]  ;;  %v768_v63 = vld [vmem:[%s2502_s12 + $0x28] sm:$0xff]  ;;  %v770_v2 = vld [vmem:[%s2502_s12 + $0x38] sm:$0xff] }
  0x2d   : > { %v2099_v10 = vld [vmem:[#allocation6 + $0x38] sm:$0xff]  ;;  %v2097_v13 = vld [vmem:[#allocation6 + $0x28] sm:$0xff] }
  0x2e   : > { %v633_v0 = vunpack.c.l.b16 %v599_v60  ;;  %v634_v3 = vunpack.c.h.b16 %v599_v60  ;;  %1004 = vmatpush.bf16.msra.mxu3 %v2099_v10  ;;  %v2093_v19 = vld [vmem:[#allocation6 + $0x8] sm:$0xff]  ;;  %v2560_v57 = vld [vmem:[%s2755_s8 + $0x1] ss:$0 sm:$0xff] }
  0x2f   : > { %567 = vmatpush.bf16.msra.mxu0 %v2071_v5 }
  0x30   : > { %798 = vperm.xlu0 %2178, %v764_v56   ;;  %v635_v1 = vpack.c.b16 %v633_v0, %v633_v0  ;;  %v636_v4 = vpack.c.b16 %v634_v3, %v634_v3 }
  0x32   : > { %818 = vperm.xlu2 %2180, %v768_v63  }
  0x33   : > { %568 = vmatpush.bf16.msra.mxu0 %v2070_v6  ;;  %808 = vperm.xlu1 %2179, %v766_v61  }
  0x37   : > { %569 = vmatpush.bf16.msra.mxu0 %v2069_v11  ;;  %v2098_v11 = vld [vmem:[#allocation6 + $0x30] sm:$0xff] }
  0x38   : > { %823 = vperm.xlu0 %2178, %v769_v62   ;;  %1005 = vmatpush.bf16.msra.mxu3 %v2098_v11 }
  0x3b   : > { %570 = vmatpush.bf16.msra.mxu0 %v2068_v14  ;;  %828 = vperm.xlu1 %2179, %v770_v2   ;;  %v2096_v14 = vld [vmem:[#allocation6 + $0x20] sm:$0xff] }
  0x3c   : > { %1006 = vmatpush.bf16.msra.mxu3 %v2097_v13 }
  0x3e   : > { %571 = vmatmul.bf16.vlgmr.msra.gmra.mxu0 %v507_v16  ;;  %v2095_v16 = vld [vmem:[#allocation6 + $0x18] sm:$0xff] }
  0x3f   : > { %735 = vmatpush.bf16.msrb.mxu0 %v2083_v15 }
  0x40   : > { %1007 = vmatpush.bf16.msra.mxu3 %v2096_v14 }
  0x43   : > { %736 = vmatpush.bf16.msrb.mxu0 %v2082_v17  ;;  %v2094_v17 = vld [vmem:[#allocation6 + $0x10] sm:$0xff] }
  0x44   : > { %1008 = vmatpush.bf16.msra.mxu3 %v2095_v16 }
  0x47   : > { %737 = vmatpush.bf16.msrb.mxu0 %v2081_v20  ;;  %v2092_v20 = vld [vmem:[#allocation6] sm:$0xff] }
  0x48   : > { %1009 = vmatpush.bf16.msra.mxu3 %v2094_v17 }
  0x4b   : > { %738 = vmatpush.bf16.msrb.mxu0 %v2080_v23 }
  0x4c   : > { %1010 = vmatpush.bf16.msra.mxu3 %v2093_v19 }
  0x4e   : > { %576 = vmatmul.bf16.gmra.mxu0 %v508_v27 }
  0x4f   : > { %739 = vmatpush.bf16.msrb.mxu0 %v2079_v26 }
  0x50   : > { %1011 = vmatpush.bf16.msra.mxu3 %v2092_v20 }
  0x53   : > { %740 = vmatpush.bf16.msrb.mxu0 %v2078_v28 }
  0x57   : > { %741 = vmatpush.bf16.msrb.mxu0 %v2077_v31 }
  0x5b   : > { %742 = vmatpush.bf16.msrb.mxu0 %v2076_v34 }
  0x5e   : > { %581 = vmatmul.bf16.gmra.mxu0 %v509_v39 }
  0x5f   : > { %748 = vmatpush.bf16.msra.mxu0 %v2091_v35  ;;  %v2539_v35 = vld [vmem:[%s2755_s8] ss:$0 sm:$0xff] }
  0x63   : > { %749 = vmatpush.bf16.msra.mxu0 %v2090_v38 }
  0x67   : > { %750 = vmatpush.bf16.msra.mxu0 %v2089_v40 }
  0x6b   : > { %751 = vmatpush.bf16.msra.mxu0 %v2088_v45 }
  0x6e   : > { %586 = vmatmul.bf16.gmra.mxu0 %v510_v52 }
  0x6f   : > { %752 = vmatpush.bf16.msra.mxu0 %v2087_v48 }
  0x73   : > { %753 = vmatpush.bf16.msra.mxu0 %v2086_v51 }
  0x77   : > { %754 = vmatpush.bf16.msra.mxu0 %v2085_v53 }
  0x7b   : > { %755 = vmatpush.bf16.msra.mxu0 %v2084_v59 }
  0x7e   : > { %743 = vmatmul.bf16.vlgmr.msrb.gmra.mxu0 %v635_v1 }
  0x84   : > { %v2528_v24 = vpop.permute.xlu2 %813 }
  0x8c   : > { %v819_v31 = vpop.permute.xlu2 %818 }
  0x8e   : > { %756 = vmatmul.bf16.vlgmr.msra.gmra.mxu0 %v636_v4 }
  0x9a   : > { %v2532_v26 = vpop.permute.xlu0 %793 }
  0x9d   : > { %v2526_v22 = vpop.permute.xlu1 %803 }
  0xa2   : > { %v2542_v38 = vpop.permute.xlu0 %798 }
  0xa5   : > { %v2530_v25 = vpop.permute.xlu1 %808 }
  0xad   : > { %v829_v32 = vpop.permute.xlu1 %828 }
  0xbb   : > { %v2514_v5 = vpop.f32.mrf.mxu0 }
  0xc3   : > { %v2516_v6 = vpop.f32.mrf.mxu0 }
  0xcb   : > { %v2518_v7 = vpop.f32.mrf.mxu0 }
  0xd3   : > { %v2520_v8 = vpop.f32.mrf.mxu0 }
  0xdb   : > { %v2522_v9 = vpop.f32.mrf.mxu0 }
  0xe3   : > { %v584_v12 = vpop.f32.mrf.mxu0 }
  0xeb   : > { %v2524_v15 = vpop.f32.mrf.mxu0 }
  0xf3   : > { %v589_v18 = vpop.f32.mrf.mxu0 }
  0xfb   : > { %v744_v21 = vpop.f32.mrf.mxu0 }
 0x103   : > { %v746_v23 = vpop.f32.mrf.mxu0 }
 0x104   : > { %v2578_v23 = vpop.permute.xlu0 %823 }
 0x10b   : > { %v757_v27 = vpop.f32.mrf.mxu0 }
 0x10c   : > { %v758_v28 = vadd.f32 %v757_v27, %v744_v21 }
 0x10e   : > { %v762_v29 = vrot.slane %v758_v28, 1  ;;  %v771_v30 = vperm.slane %v758_v28, 0 }
 0x110   : > { %v2534_v33 = vperm.slane %v762_v29, 0  ;;  %v780_v34 = vadd.f32 %v771_v30, %v584_v12  ;;  %v782_v36 = vadd.f32 %v771_v30, %v589_v18  ;;  %v775_v37 = vadd.f32 %v771_v30, %v2514_v5 }
 0x111   : > { %v776_v39 = vadd.f32 %v771_v30, %v2516_v6  ;;  %v777_v40 = vadd.f32 %v771_v30, %v2518_v7  ;;  %v778_v41 = vadd.f32 %v771_v30, %v2520_v8  ;;  %v779_v63 = vadd.f32 %v771_v30, %v2522_v9 }
 0x112   : > { %v788_v42 = vadd.f32 %v2534_v33, %v584_v12  ;;  %v836_v43 = vmul.f32 %v819_v31, %v780_v34  ;;  %v790_v44 = vadd.f32 %v2534_v33, %v589_v18  ;;  %v838_v45 = vmul.f32 %v829_v32, %v782_v36 }
 0x113   : > { %v759_v46 = vpop.f32.mrf.mxu0  ;;  %v831_v47 = vmul.f32 %v2532_v26, %v775_v37  ;;  %v832_v48 = vmul.f32 %v2542_v38, %v776_v39  ;;  %v833_v49 = vmul.f32 %v2526_v22, %v777_v40  ;;  %v834_v50 = vmul.f32 %v2530_v25, %v778_v41 }
 0x114   : > { %v844_v51 = vmul.f32 %v819_v31, %v788_v42  ;;  %v853_v52 = vadd.f32 %v2539_v35, %v836_v43  ;;  %v846_v53 = vmul.f32 %v829_v32, %v790_v44  ;;  %v855_v54 = vadd.f32 %v2539_v35, %v838_v45 }
 0x115   : > { %v848_v55 = vadd.f32 %v2539_v35, %v831_v47  ;;  %v849_v56 = vadd.f32 %v2539_v35, %v832_v48  ;;  %v850_v58 = vadd.f32 %v2539_v35, %v833_v49  ;;  %v851_v59 = vadd.f32 %v2539_v35, %v834_v50 }
 0x116   : > { %v2565_v60 = vadd.f32 %v2539_v35, %v844_v51  ;;  %v885_v61 = vmin.f32 %v853_v52, 0.0  ;;  %v2568_v62 = vadd.f32 %v2539_v35, %v846_v53  ;;  %v887_v0 = vmin.f32 %v855_v54, 0.0 }
 0x117   : > { %v864_v1 = vmax.f32 %v848_v55, 0.0  ;;  %v880_v2 = vmin.f32 %v848_v55, 0.0  ;;  %v881_v3 = vmin.f32 %v849_v56, 0.0  ;;  %v865_v11 = vmax.f32 %v849_v56, 0.0 }
 0x118   : > { %v893_v4 = vmin.f32 %v2565_v60, 0.0  ;;  %v895_v10 = vmin.f32 %v2568_v62, 0.0  ;;  %v866_v12 = vmax.f32 %v850_v58, 0.0  ;;  %v882_v16 = vmin.f32 %v850_v58, 0.0 }
 0x119   : > { %v897_v13 = vmul.f32 %v2560_v57, %v880_v2  ;;  %v898_v14 = vmul.f32 %v2560_v57, %v881_v3  ;;  %v883_v17 = vmin.f32 %v851_v59, 0.0  ;;  %v835_v18 = vmul.f32 %v2528_v24, %v779_v63 }
 0x11a   : > { %v869_v19 = vmax.f32 %v853_v52, 0.0  ;;  %v902_v20 = vmul.f32 %v2560_v57, %v885_v61  ;;  %v781_v21 = vadd.f32 %v771_v30, %v2524_v15  ;;  %v899_v29 = vmul.f32 %v2560_v57, %v882_v16 }
 0x11b   : > { %v913_v27 = vadd.f32 %v897_v13, %v864_v1  ;;  %v914_v28 = vadd.f32 %v898_v14, %v865_v11  ;;  %v900_v31 = vmul.f32 %v2560_v57, %v883_v17  ;;  %v867_v32 = vmax.f32 %v851_v59, 0.0 }
 0x11c   : > { %v852_v34 = vadd.f32 %v2539_v35, %v835_v18  ;;  %v2583_v36 = vadd.f32 %v902_v20, %v869_v19  ;;  %v837_v37 = vmul.f32 %v2578_v23, %v781_v21  ;;  %v2586_v40 = vadd.f32 %v899_v29, %v866_v12 }
 0x11d   : > { %v929_v39 = vpack.c.bf16 %v914_v28, %v913_v27  ;;  %v871_v41 = vmax.f32 %v855_v54, 0.0  ;;  %v904_v30 = vmul.f32 %v2560_v57, %v887_v0  ;;  %v916_v42 = vadd.f32 %v900_v31, %v867_v32 }
 0x11e   : > { %v884_v43 = vmin.f32 %v852_v34, 0.0  ;;  %v854_v44 = vadd.f32 %v2539_v35, %v837_v37  ;;  %v783_v45 = vadd.f32 %v2534_v33, %v2514_v5  ;;  %v868_v46 = vmax.f32 %v852_v34, 0.0 }
 0x11f   : > { %1012 = vmatmul.bf16.vlgmr.msra.gmra.mxu3 %v929_v39  ;;  %v2592_v47 = vadd.f32 %v904_v30, %v871_v41  ;;  %v784_v48 = vadd.f32 %v2534_v33, %v2516_v6  ;;  %v785_v49 = vadd.f32 %v2534_v33, %v2518_v7  ;;  %v786_v5 = vadd.f32 %v2534_v33, %v2520_v8 }
 0x120   : > { %v901_v50 = vmul.f32 %v2560_v57, %v884_v43  ;;  %v870_v51 = vmax.f32 %v854_v44, 0.0  ;;  %v886_v52 = vmin.f32 %v854_v44, 0.0  ;;  %v839_v53 = vmul.f32 %v2532_v26, %v783_v45 }
 0x121   : > { %v840_v54 = vmul.f32 %v2542_v38, %v784_v48  ;;  %v841_v55 = vmul.f32 %v2526_v22, %v785_v49  ;;  %v787_v56 = vadd.f32 %v2534_v33, %v2522_v9  ;;  %v877_v59 = vmax.f32 %v2565_v60, 0.0 }
 0x122   : > { %v917_v6 = vadd.f32 %v901_v50, %v868_v46  ;;  %v903_v58 = vmul.f32 %v2560_v57, %v886_v52  ;;  %v856_v7 = vadd.f32 %v2539_v35, %v839_v53  ;;  %v842_v26 = vmul.f32 %v2530_v25, %v786_v5  ;;  %v2102_v50 = vld [vmem:[#allocation7 + $0x10] sm:$0xff]  ;;  %v454_v52 = vld [vmem:[%s2755_s8 + $0x2] sm:$0x1] }
 0x123   : > { %v857_v61 = vadd.f32 %v2539_v35, %v840_v54  ;;  %v858_v38 = vadd.f32 %v2539_v35, %v841_v55  ;;  %v843_v8 = vmul.f32 %v2528_v24, %v787_v56  ;;  %v910_v18 = vmul.f32 %v2560_v57, %v893_v4 }
 0x124   : > { %v931_v22 = vpack.c.bf16 %v2583_v36, %v917_v6  ;;  %v919_v63 = vadd.f32 %v903_v58, %v870_v51  ;;  %v872_v0 = vmax.f32 %v856_v7, 0.0  ;;  %v888_v9 = vmin.f32 %v856_v7, 0.0  ;;  %v2100_v51 = vld [vmem:[#allocation7] sm:$0xff] }
 0x125   : > { %v873_v1 = vmax.f32 %v857_v61, 0.0  ;;  %v889_v2 = vmin.f32 %v857_v61, 0.0  ;;  %v859_v3 = vadd.f32 %v2539_v35, %v842_v26  ;;  %v874_v11 = vmax.f32 %v858_v38, 0.0 }
 0x126   : > { %v932_v12 = vpack.c.bf16 %v2592_v47, %v919_v63  ;;  %v905_v13 = vmul.f32 %v2560_v57, %v888_v9  ;;  %v890_v14 = vmin.f32 %v858_v38, 0.0  ;;  %v860_v25 = vadd.f32 %v2539_v35, %v843_v8 }
 0x127   : > { %v906_v16 = vmul.f32 %v2560_v57, %v889_v2  ;;  %v875_v24 = vmax.f32 %v859_v3, 0.0  ;;  %v891_v17 = vmin.f32 %v859_v3, 0.0  ;;  %v926_v31 = vadd.f32 %v910_v18, %v877_v59 }
 0x128   : > { %v921_v19 = vadd.f32 %v905_v13, %v872_v0  ;;  %v907_v20 = vmul.f32 %v2560_v57, %v890_v14  ;;  %v876_v21 = vmax.f32 %v860_v25, 0.0  ;;  %v892_v27 = vmin.f32 %v860_v25, 0.0 }
 0x129   : > { %v922_v28 = vadd.f32 %v906_v16, %v873_v1  ;;  %v908_v29 = vmul.f32 %v2560_v57, %v891_v17  ;;  %v789_v32 = vadd.f32 %v2534_v33, %v2524_v15  ;;  %v879_v37 = vmax.f32 %v2568_v62, 0.0 }
 0x12a   : > { %v923_v34 = vadd.f32 %v907_v20, %v874_v11  ;;  %v909_v36 = vmul.f32 %v2560_v57, %v892_v27  ;;  %v912_v60 = vmul.f32 %v2560_v57, %v895_v10  ;;  %v930_v44 = vpack.c.bf16 %v916_v42, %v2586_v40  ;;  %v2107_v10 = vld [vmem:[#allocation7 + $0x38] sm:$0xff]  ;;  %v2105_v40 = vld [vmem:[#allocation7 + $0x28] sm:$0xff]  ;;  %v2104_v42 = vld [vmem:[#allocation7 + $0x20] sm:$0xff] }
 0x12b   : > { %v933_v4 = vpack.c.bf16 %v922_v28, %v921_v19  ;;  %v924_v39 = vadd.f32 %v908_v29, %v875_v24  ;;  %v845_v41 = vmul.f32 %v2578_v23, %v789_v32  ;;  %1178 = vmatpush.bf16.msra.mxu1 %v2107_v10  ;;  %v2106_v23 = vld [vmem:[#allocation7 + $0x30] sm:$0xff]  ;;  %v937_v53 = vpack.c.bf16 %v454_v52, %v454_v52 }
 0x12c   : > { %v925_v30 = vadd.f32 %v909_v36, %v876_v21  ;;  %v928_v43 = vadd.f32 %v912_v60, %v879_v37 }
 0x12d   : > { %v934_v45 = vpack.c.bf16 %v924_v39, %v923_v34  ;;  %v862_v15 = vadd.f32 %v2539_v35, %v845_v41  ;;  %v2103_v35 = vld [vmem:[#allocation7 + $0x18] sm:$0xff]  ;;  %v1070_v5 = vpack.i.b16 %v937_v53, %v937_v53 }
 0x12e   : > { %v935_v33 = vpack.c.bf16 %v926_v31, %v925_v30 }
 0x12f   : > { %1017 = vmatmul.bf16.gmra.mxu3 %v930_v44  ;;  %v894_v46 = vmin.f32 %v862_v15, 0.0  ;;  %v878_v47 = vmax.f32 %v862_v15, 0.0  ;;  %1179 = vmatpush.bf16.msra.mxu1 %v2106_v23  ;;  %v1072_v56 = vperm.slane %v1070_v5, 0 }
 0x131   : > { %v911_v48 = vmul.f32 %v2560_v57, %v894_v46  ;;  %v2101_v57 = vld [vmem:[#allocation7 + $0x8] sm:$0xff]  ;;  %v2638_v7 = vunpack.c.l.bf16 %v1072_v56 }
 0x133   : > { %v927_v62 = vadd.f32 %v911_v48, %v878_v47  ;;  %1180 = vmatpush.bf16.msra.mxu1 %v2105_v40 }
 0x135   : > { %v936_v49 = vpack.c.bf16 %v928_v43, %v927_v62 }
 0x137   : > { %1181 = vmatpush.bf16.msra.mxu1 %v2104_v42 }
 0x13b   : > { %1182 = vmatpush.bf16.msra.mxu1 %v2103_v35  ;;  %v2115_v35 = vld [vmem:[#allocation9 + $0x38] sm:$0xff] }
 0x13c   : > { %1400 = vmatpush.bf16.msra.mxu2 %v2115_v35 }
 0x13f   : > { %1022 = vmatmul.bf16.gmra.mxu3 %v931_v22  ;;  %1183 = vmatpush.bf16.msra.mxu1 %v2102_v50  ;;  %v2114_v50 = vld [vmem:[#allocation9 + $0x30] sm:$0xff] }
 0x140   : > { %1401 = vmatpush.bf16.msra.mxu2 %v2114_v50 }
 0x143   : > { %1184 = vmatpush.bf16.msra.mxu1 %v2101_v57 }
 0x147   : > { %1185 = vmatpush.bf16.msra.mxu1 %v2100_v51  ;;  %v2113_v51 = vld [vmem:[#allocation9 + $0x28] sm:$0xff] }
 0x148   : > { %1402 = vmatpush.bf16.msra.mxu2 %v2113_v51 }
 0x14f   : > { %1027 = vmatmul.bf16.gmra.mxu3 %v932_v12 }
 0x15f   : > { %1032 = vmatmul.bf16.gmra.mxu3 %v933_v4 }
 0x16f   : > { %1037 = vmatmul.bf16.gmra.mxu3 %v934_v45 }
 0x17f   : > { %1042 = vmatmul.bf16.gmra.mxu3 %v935_v33 }
 0x18f   : > { %1047 = vmatmul.bf16.gmra.mxu3 %v936_v49 }
 0x1a2   : > { %v1013_v54 = vpop.f32.mrf.mxu3 }
 0x1a3   : > { %v1053_v55 = vpack.c.bf16 %v1013_v54, %v1013_v54 }
 0x1a5   : > { %v1073_v58 = vunpack.c.l.bf16 %v1053_v55 }
 0x1a7   : > { %v1090_v26 = vadd.f32 %v2638_v7, %v1073_v58 }
 0x1aa   : > { %v1015_v6 = vpop.f32.mrf.mxu3 }
 0x1ab   : > { %v1054_v59 = vpack.c.bf16 %v1015_v6, %v1015_v6 }
 0x1ad   : > { %v1074_v61 = vunpack.c.l.bf16 %v1054_v59  ;;  %v2112_v59 = vld [vmem:[#allocation9 + $0x20] sm:$0xff] }
 0x1ae   : > { %1403 = vmatpush.bf16.msra.mxu2 %v2112_v59 }
 0x1af   : > { %v1091_v38 = vadd.f32 %v2638_v7, %v1074_v61 }
 0x1b1   : > { %v1106_v8 = vpack.c.bf16 %v1091_v38, %v1090_v26  ;;  %v2111_v26 = vld [vmem:[#allocation9 + $0x18] sm:$0xff] }
 0x1b2   : > { %v1018_v22 = vpop.f32.mrf.mxu3  ;;  %1404 = vmatpush.bf16.msra.mxu2 %v2111_v26 }
 0x1b3   : > { %1186 = vmatmul.bf16.vlgmr.msra.gmra.mxu1 %v1106_v8  ;;  %v1055_v63 = vpack.c.bf16 %v1018_v22, %v1018_v22 }
 0x1b5   : > { %v1075_v9 = vunpack.c.l.bf16 %v1055_v63 }
 0x1b7   : > { %v1092_v3 = vadd.f32 %v2638_v7, %v1075_v9 }
 0x1ba   : > { %v1020_v0 = vpop.f32.mrf.mxu3 }
 0x1bb   : > { %v1056_v1 = vpack.c.bf16 %v1020_v0, %v1020_v0  ;;  %v2110_v0 = vld [vmem:[#allocation9 + $0x10] sm:$0xff] }
 0x1bc   : > { %1405 = vmatpush.bf16.msra.mxu2 %v2110_v0 }
 0x1bd   : > { %v1076_v2 = vunpack.c.l.bf16 %v1056_v1 }
 0x1bf   : > { %v1093_v11 = vadd.f32 %v2638_v7, %v1076_v2  ;;  %v2109_v2 = vld [vmem:[#allocation9 + $0x8] sm:$0xff] }
 0x1c0   : > { %1406 = vmatpush.bf16.msra.mxu2 %v2109_v2 }
 0x1c1   : > { %v1107_v12 = vpack.c.bf16 %v1093_v11, %v1092_v3  ;;  %v2108_v11 = vld [vmem:[#allocation9] sm:$0xff] }
 0x1c2   : > { %v1023_v13 = vpop.f32.mrf.mxu3 }
 0x1c3   : > { %1191 = vmatmul.bf16.gmra.mxu1 %v1107_v12  ;;  %v1057_v14 = vpack.c.bf16 %v1023_v13, %v1023_v13  ;;  %v455_v12 = vld [vmem:[%s2755_s8 + $0x3] sm:$0x1] }
 0x1c4   : > { %1407 = vmatpush.bf16.msra.mxu2 %v2108_v11  ;;  %v938_v13 = vpack.c.bf16 %v455_v12, %v455_v12 }
 0x1c5   : > { %v1077_v16 = vunpack.c.l.bf16 %v1057_v14 }
 0x1c6   : > { %v1244_v14 = vpack.i.b16 %v938_v13, %v938_v13 }
 0x1c7   : > { %v1094_v18 = vadd.f32 %v2638_v7, %v1077_v16 }
 0x1ca   : > { %v1025_v25 = vpop.f32.mrf.mxu3 }
 0x1cb   : > { %v1058_v24 = vpack.c.bf16 %v1025_v25, %v1025_v25 }
 0x1cd   : > { %v1078_v17 = vunpack.c.l.bf16 %v1058_v24  ;;  %v1246_v24 = vperm.slane %v1244_v14, 0 }
 0x1cf   : > { %v1095_v19 = vadd.f32 %v2638_v7, %v1078_v17 }
 0x1d1   : > { %v1108_v20 = vpack.c.bf16 %v1095_v19, %v1094_v18  ;;  %v2659_v18 = vunpack.c.l.bf16 %v1246_v24 }
 0x1d2   : > { %v1028_v21 = vpop.f32.mrf.mxu3 }
 0x1d3   : > { %1196 = vmatmul.bf16.gmra.mxu1 %v1108_v20  ;;  %v1059_v27 = vpack.c.bf16 %v1028_v21, %v1028_v21 }
 0x1d5   : > { %v1079_v29 = vunpack.c.l.bf16 %v1059_v27 }
 0x1d7   : > { %v1096_v34 = vadd.f32 %v2638_v7, %v1079_v29 }
 0x1da   : > { %v1030_v28 = vpop.f32.mrf.mxu3 }
 0x1db   : > { %v1060_v31 = vpack.c.bf16 %v1030_v28, %v1030_v28 }
 0x1dd   : > { %v1080_v32 = vunpack.c.l.bf16 %v1060_v31 }
 0x1df   : > { %v1097_v36 = vadd.f32 %v2638_v7, %v1080_v32 }
 0x1e1   : > { %v1109_v37 = vpack.c.bf16 %v1097_v36, %v1096_v34 }
 0x1e2   : > { %v1033_v60 = vpop.f32.mrf.mxu3 }
 0x1e3   : > { %1201 = vmatmul.bf16.gmra.mxu1 %v1109_v37  ;;  %v1061_v4 = vpack.c.bf16 %v1033_v60, %v1033_v60 }
 0x1e5   : > { %v1081_v41 = vunpack.c.l.bf16 %v1061_v4 }
 0x1e7   : > { %v1098_v44 = vadd.f32 %v2638_v7, %v1081_v41 }
 0x1ea   : > { %v1035_v39 = vpop.f32.mrf.mxu3 }
 0x1eb   : > { %v1062_v30 = vpack.c.bf16 %v1035_v39, %v1035_v39 }
 0x1ed   : > { %v1082_v43 = vunpack.c.l.bf16 %v1062_v30 }
 0x1ef   : > { %v1099_v45 = vadd.f32 %v2638_v7, %v1082_v43 }
 0x1f1   : > { %v1110_v15 = vpack.c.bf16 %v1099_v45, %v1098_v44 }
 0x1f2   : > { %v1038_v33 = vpop.f32.mrf.mxu3 }
 0x1f3   : > { %1206 = vmatmul.bf16.gmra.mxu1 %v1110_v15  ;;  %v1063_v46 = vpack.c.bf16 %v1038_v33, %v1038_v33 }
 0x1f5   : > { %v1083_v48 = vunpack.c.l.bf16 %v1063_v46 }
 0x1f7   : > { %v1100_v10 = vadd.f32 %v2638_v7, %v1083_v48 }
 0x1fa   : > { %v1040_v47 = vpop.f32.mrf.mxu3 }
 0x1fb   : > { %v1064_v62 = vpack.c.bf16 %v1040_v47, %v1040_v47 }
 0x1fd   : > { %v1084_v49 = vunpack.c.l.bf16 %v1064_v62 }
 0x1ff   : > { %v1101_v23 = vadd.f32 %v2638_v7, %v1084_v49 }
 0x201   : > { %v1111_v40 = vpack.c.bf16 %v1101_v23, %v1100_v10 }
 0x202   : > { %v1043_v42 = vpop.f32.mrf.mxu3 }
 0x203   : > { %1211 = vmatmul.bf16.gmra.mxu1 %v1111_v40  ;;  %v1065_v57 = vpack.c.bf16 %v1043_v42, %v1043_v42 }
 0x205   : > { %v1085_v53 = vunpack.c.l.bf16 %v1065_v57 }
 0x207   : > { %v1102_v55 = vadd.f32 %v2638_v7, %v1085_v53 }
 0x20a   : > { %v1045_v52 = vpop.f32.mrf.mxu3 }
 0x20b   : > { %v1066_v54 = vpack.c.bf16 %v1045_v52, %v1045_v52 }
 0x20d   : > { %v1086_v5 = vunpack.c.l.bf16 %v1066_v54 }
 0x20f   : > { %v1103_v56 = vadd.f32 %v2638_v7, %v1086_v5 }
 0x211   : > { %v1112_v6 = vpack.c.bf16 %v1103_v56, %v1102_v55 }
 0x212   : > { %v1048_v58 = vpop.f32.mrf.mxu3 }
 0x213   : > { %1216 = vmatmul.bf16.gmra.mxu1 %v1112_v6  ;;  %v1067_v61 = vpack.c.bf16 %v1048_v58, %v1048_v58 }
 0x215   : > { %v1087_v8 = vunpack.c.l.bf16 %v1067_v61 }
 0x217   : > { %v1104_v9 = vadd.f32 %v2638_v7, %v1087_v8 }
 0x21a   : > { %v1050_v38 = vpop.f32.mrf.mxu3 }
 0x21b   : > { %v1068_v22 = vpack.c.bf16 %v1050_v38, %v1050_v38 }
 0x21d   : > { %v1088_v63 = vunpack.c.l.bf16 %v1068_v22 }
 0x21f   : > { %v1105_v1 = vadd.f32 %v2638_v7, %v1088_v63 }
 0x221   : > { %v1113_v3 = vpack.c.bf16 %v1105_v1, %v1104_v9 }
 0x223   : > { %1221 = vmatmul.bf16.gmra.mxu1 %v1113_v3 }
 0x230   : > { %v1187_v25 = vpop.f32.mrf.mxu1 }
 0x231   : > { %v1227_v16 = vpack.c.bf16 %v1187_v25, %v1187_v25 }
 0x233   : > { %v1247_v17 = vunpack.c.l.bf16 %v1227_v16 }
 0x235   : > { %v1264_v20 = vadd.f32 %v2659_v18, %v1247_v17 }
 0x237   : > { %v1312_v28 = vmax.f32 %v1264_v20, 0.0 }
 0x238   : > { %v1189_v7 = vpop.f32.mrf.mxu1 }
 0x239   : > { %v1228_v19 = vpack.c.bf16 %v1189_v7, %v1189_v7 }
 0x23b   : > { %v1248_v21 = vunpack.c.l.bf16 %v1228_v19 }
 0x23d   : > { %v1265_v27 = vadd.f32 %v2659_v18, %v1248_v21 }
 0x23f   : > { %v1313_v29 = vmax.f32 %v1265_v27, 0.0 }
 0x240   : > { %v1192_v31 = vpop.f32.mrf.mxu1 }
 0x241   : > { %v1328_v32 = vpack.c.bf16 %v1313_v29, %v1312_v28  ;;  %v1229_v34 = vpack.c.bf16 %v1192_v31, %v1192_v31 }
 0x243   : > { %1408 = vmatmul.bf16.vlgmr.msra.gmra.mxu2 %v1328_v32  ;;  %v1249_v36 = vunpack.c.l.bf16 %v1229_v34 }
 0x245   : > { %v1266_v4 = vadd.f32 %v2659_v18, %v1249_v36 }
 0x247   : > { %v1314_v30 = vmax.f32 %v1266_v4, 0.0 }
 0x248   : > { %v1194_v37 = vpop.f32.mrf.mxu1 }
 0x249   : > { %v1230_v60 = vpack.c.bf16 %v1194_v37, %v1194_v37 }
 0x24b   : > { %v1250_v39 = vunpack.c.l.bf16 %v1230_v60 }
 0x24d   : > { %v1267_v41 = vadd.f32 %v2659_v18, %v1250_v39 }
 0x24f   : > { %v1315_v43 = vmax.f32 %v1267_v41, 0.0 }
 0x250   : > { %v1197_v44 = vpop.f32.mrf.mxu1 }
 0x251   : > { %v1329_v45 = vpack.c.bf16 %v1315_v43, %v1314_v30  ;;  %v1231_v15 = vpack.c.bf16 %v1197_v44, %v1197_v44 }
 0x253   : > { %1413 = vmatmul.bf16.gmra.mxu2 %v1329_v45  ;;  %v1251_v33 = vunpack.c.l.bf16 %v1231_v15 }
 0x255   : > { %v1268_v48 = vadd.f32 %v2659_v18, %v1251_v33 }
 0x257   : > { %v1316_v10 = vmax.f32 %v1268_v48, 0.0 }
 0x258   : > { %v1199_v46 = vpop.f32.mrf.mxu1 }
 0x259   : > { %v1232_v47 = vpack.c.bf16 %v1199_v46, %v1199_v46  ;;  %v456_v46 = vld [vmem:[%s2755_s8 + $0x4] sm:$0x1] }
 0x25b   : > { %v1252_v62 = vunpack.c.l.bf16 %v1232_v47  ;;  %v939_v47 = vpack.c.bf16 %v456_v46, %v456_v46 }
 0x25d   : > { %v1269_v49 = vadd.f32 %v2659_v18, %v1252_v62  ;;  %v1466_v48 = vpack.i.b16 %v939_v47, %v939_v47 }
 0x25f   : > { %v1317_v23 = vmax.f32 %v1269_v49, 0.0  ;;  %v1468_v62 = vperm.slane %v1466_v48, 0 }
 0x260   : > { %v1202_v40 = vpop.f32.mrf.mxu1 }
 0x261   : > { %v1330_v42 = vpack.c.bf16 %v1317_v23, %v1316_v10  ;;  %v1233_v35 = vpack.c.bf16 %v1202_v40, %v1202_v40  ;;  %v2680_v23 = vunpack.c.l.bf16 %v1468_v62 }
 0x263   : > { %1418 = vmatmul.bf16.gmra.mxu2 %v1330_v42  ;;  %v1253_v50 = vunpack.c.l.bf16 %v1233_v35 }
 0x265   : > { %v1270_v52 = vadd.f32 %v2659_v18, %v1253_v50 }
 0x267   : > { %v1318_v5 = vmax.f32 %v1270_v52, 0.0 }
 0x268   : > { %v1204_v57 = vpop.f32.mrf.mxu1 }
 0x269   : > { %v1234_v51 = vpack.c.bf16 %v1204_v57, %v1204_v57 }
 0x26b   : > { %v1254_v53 = vunpack.c.l.bf16 %v1234_v51  ;;  %v2686_v51 = vld [vmem:[%s2755_s8 + $0x5] ss:$0 sm:$0xff] }
 0x26d   : > { %v1271_v54 = vadd.f32 %v2659_v18, %v1254_v53 }
 0x26f   : > { %v1319_v55 = vmax.f32 %v1271_v54, 0.0  ;;  %v2691_v54 = vld [vmem:[%s2755_s8 + $0x6] ss:$0 sm:$0xff] }
 0x270   : > { %v1207_v56 = vpop.f32.mrf.mxu1 }
 0x271   : > { %v1331_v6 = vpack.c.bf16 %v1319_v55, %v1318_v5  ;;  %v1235_v58 = vpack.c.bf16 %v1207_v56, %v1207_v56 }
 0x273   : > { %1423 = vmatmul.bf16.gmra.mxu2 %v1331_v6  ;;  %v1255_v59 = vunpack.c.l.bf16 %v1235_v58 }
 0x275   : > { %v1272_v38 = vadd.f32 %v2659_v18, %v1255_v59 }
 0x277   : > { %v1320_v63 = vmax.f32 %v1272_v38, 0.0 }
 0x278   : > { %v1209_v61 = vpop.f32.mrf.mxu1 }
 0x279   : > { %v1236_v26 = vpack.c.bf16 %v1209_v61, %v1209_v61 }
 0x27b   : > { %v1256_v8 = vunpack.c.l.bf16 %v1236_v26 }
 0x27d   : > { %v1273_v22 = vadd.f32 %v2659_v18, %v1256_v8 }
 0x27f   : > { %v1321_v0 = vmax.f32 %v1273_v22, 0.0 }
 0x280   : > { %v1212_v9 = vpop.f32.mrf.mxu1 }
 0x281   : > { %v1332_v1 = vpack.c.bf16 %v1321_v0, %v1320_v63  ;;  %v1237_v2 = vpack.c.bf16 %v1212_v9, %v1212_v9 }
 0x283   : > { %1428 = vmatmul.bf16.gmra.mxu2 %v1332_v1  ;;  %v1257_v3 = vunpack.c.l.bf16 %v1237_v2 }
 0x285   : > { %v1274_v13 = vadd.f32 %v2659_v18, %v1257_v3 }
 0x287   : > { %v1322_v16 = vmax.f32 %v1274_v13, 0.0 }
 0x288   : > { %v1214_v11 = vpop.f32.mrf.mxu1 }
 0x289   : > { %v1238_v12 = vpack.c.bf16 %v1214_v11, %v1214_v11 }
 0x28b   : > { %v1258_v14 = vunpack.c.l.bf16 %v1238_v12 }
 0x28d   : > { %v1275_v25 = vadd.f32 %v2659_v18, %v1258_v14 }
 0x28f   : > { %v1323_v24 = vmax.f32 %v1275_v25, 0.0 }
 0x290   : > { %v1217_v17 = vpop.f32.mrf.mxu1 }
 0x291   : > { %v1333_v7 = vpack.c.bf16 %v1323_v24, %v1322_v16  ;;  %v1239_v19 = vpack.c.bf16 %v1217_v17, %v1217_v17 }
 0x293   : > { %1433 = vmatmul.bf16.gmra.mxu2 %v1333_v7  ;;  %v1259_v20 = vunpack.c.l.bf16 %v1239_v19 }
 0x295   : > { %v1276_v28 = vadd.f32 %v2659_v18, %v1259_v20 }
 0x297   : > { %v1324_v32 = vmax.f32 %v1276_v28, 0.0 }
 0x298   : > { %v1219_v21 = vpop.f32.mrf.mxu1 }
 0x299   : > { %v1240_v27 = vpack.c.bf16 %v1219_v21, %v1219_v21 }
 0x29b   : > { %v1260_v29 = vunpack.c.l.bf16 %v1240_v27 }
 0x29d   : > { %v1277_v31 = vadd.f32 %v2659_v18, %v1260_v29 }
 0x29f   : > { %v1325_v34 = vmax.f32 %v1277_v31, 0.0 }
 0x2a0   : > { %v1222_v36 = vpop.f32.mrf.mxu1 }
 0x2a1   : > { %v1334_v37 = vpack.c.bf16 %v1325_v34, %v1324_v32  ;;  %v1241_v60 = vpack.c.bf16 %v1222_v36, %v1222_v36 }
 0x2a3   : > { %1438 = vmatmul.bf16.gmra.mxu2 %v1334_v37  ;;  %v1261_v4 = vunpack.c.l.bf16 %v1241_v60 }
 0x2a5   : > { %v1278_v30 = vadd.f32 %v2659_v18, %v1261_v4 }
 0x2a7   : > { %v1326_v15 = vmax.f32 %v1278_v30, 0.0 }
 0x2a8   : > { %v1224_v39 = vpop.f32.mrf.mxu1 }
 0x2a9   : > { %v1242_v41 = vpack.c.bf16 %v1224_v39, %v1224_v39 }
 0x2ab   : > { %v1262_v43 = vunpack.c.l.bf16 %v1242_v41 }
 0x2ad   : > { %v1279_v44 = vadd.f32 %v2659_v18, %v1262_v43 }
 0x2af   : > { %v1327_v45 = vmax.f32 %v1279_v44, 0.0 }
 0x2b1   : > { %v1335_v33 = vpack.c.bf16 %v1327_v45, %v1326_v15 }
 0x2b3   : > { %1443 = vmatmul.bf16.gmra.mxu2 %v1335_v33 }
 0x2c6   : > { %v1409_v49 = vpop.f32.mrf.mxu2 }
 0x2c7   : > { %v1449_v10 = vpack.c.bf16 %v1409_v49, %v1409_v49 }
 0x2c9   : > { %v1469_v40 = vunpack.c.l.bf16 %v1449_v10 }
 0x2cb   : > { %v1486_v42 = vadd.f32 %v2680_v23, %v1469_v40 }
 0x2cd   : > { %v1534_v35 = vmax.f32 %v1486_v42, 0.0 }
 0x2ce   : > { %v1411_v18 = vpop.f32.mrf.mxu2 }
 0x2cf   : > { %v1550_v50 = vpack.c.bf16 %v1534_v35, %v1534_v35  ;;  %v1450_v57 = vpack.c.bf16 %v1411_v18, %v1411_v18 }
 0x2d1   : > { %v1566_v52 = vunpack.c.l.bf16 %v1550_v50  ;;  %v1470_v53 = vunpack.c.l.bf16 %v1450_v57 }
 0x2d3   : > { %v1487_v5 = vadd.f32 %v2680_v23, %v1470_v53  ;;  %v1583_v55 = vmul.f32 %v2686_v51, %v1566_v52 }
 0x2d5   : > { %v1535_v56 = vmax.f32 %v1487_v5, 0.0  ;;  %v1600_v6 = vadd.f32 %v2691_v54, %v1583_v55 }
 0x2d6   : > { %v1414_v58 = vpop.f32.mrf.mxu2 }
 0x2d7   : > { %v1551_v59 = vpack.c.bf16 %v1535_v56, %v1535_v56  ;;  %v1451_v61 = vpack.c.bf16 %v1414_v58, %v1414_v58  ;;  %1616 = vadd.xlane.f32.xlu2 %v1600_v6 }
 0x2d9   : > { %v1567_v26 = vunpack.c.l.bf16 %v1551_v59  ;;  %v1471_v38 = vunpack.c.l.bf16 %v1451_v61 }
 0x2db   : > { %v1488_v8 = vadd.f32 %v2680_v23, %v1471_v38  ;;  %v1584_v22 = vmul.f32 %v2686_v51, %v1567_v26 }
 0x2dd   : > { %v1536_v63 = vmax.f32 %v1488_v8, 0.0  ;;  %v1601_v0 = vadd.f32 %v2691_v54, %v1584_v22 }
 0x2de   : > { %v1416_v9 = vpop.f32.mrf.mxu2 }
 0x2df   : > { %v1552_v1 = vpack.c.bf16 %v1536_v63, %v1536_v63  ;;  %v1452_v2 = vpack.c.bf16 %v1416_v9, %v1416_v9  ;;  %1618 = vadd.xlane.f32.xlu0 %v1601_v0 }
 0x2e1   : > { %v1568_v3 = vunpack.c.l.bf16 %v1552_v1  ;;  %v1472_v11 = vunpack.c.l.bf16 %v1452_v2 }
 0x2e3   : > { %v1489_v12 = vadd.f32 %v2680_v23, %v1472_v11  ;;  %v1585_v13 = vmul.f32 %v2686_v51, %v1568_v3 }
 0x2e5   : > { %v1537_v14 = vmax.f32 %v1489_v12, 0.0  ;;  %v1602_v25 = vadd.f32 %v2691_v54, %v1585_v13 }
 0x2e6   : > { %v1419_v16 = vpop.f32.mrf.mxu2 }
 0x2e7   : > { %v1553_v24 = vpack.c.bf16 %v1537_v14, %v1537_v14  ;;  %v1453_v17 = vpack.c.bf16 %v1419_v16, %v1419_v16  ;;  %1620 = vadd.xlane.f32.xlu1 %v1602_v25 }
 0x2e9   : > { %v1569_v7 = vunpack.c.l.bf16 %v1553_v24  ;;  %v1473_v19 = vunpack.c.l.bf16 %v1453_v17 }
 0x2eb   : > { %v1490_v20 = vadd.f32 %v2680_v23, %v1473_v19  ;;  %v1586_v21 = vmul.f32 %v2686_v51, %v1569_v7 }
 0x2ed   : > { %v1538_v27 = vmax.f32 %v1490_v20, 0.0  ;;  %v1603_v28 = vadd.f32 %v2691_v54, %v1586_v21 }
 0x2ee   : > { %v1421_v29 = vpop.f32.mrf.mxu2 }
 0x2ef   : > { %v1554_v31 = vpack.c.bf16 %v1538_v27, %v1538_v27  ;;  %v1454_v32 = vpack.c.bf16 %v1421_v29, %v1421_v29  ;;  %1622 = vadd.xlane.f32.xlu2 %v1603_v28 }
 0x2f1   : > { %v1570_v34 = vunpack.c.l.bf16 %v1554_v31  ;;  %v1474_v36 = vunpack.c.l.bf16 %v1454_v32 }
 0x2f3   : > { %v1491_v37 = vadd.f32 %v2680_v23, %v1474_v36  ;;  %v1587_v60 = vmul.f32 %v2686_v51, %v1570_v34 }
 0x2f5   : > { %v1539_v4 = vmax.f32 %v1491_v37, 0.0  ;;  %v1604_v39 = vadd.f32 %v2691_v54, %v1587_v60 }
 0x2f6   : > { %v1424_v41 = vpop.f32.mrf.mxu2 }
 0x2f7   : > { %v1555_v30 = vpack.c.bf16 %v1539_v4, %v1539_v4  ;;  %v1455_v43 = vpack.c.bf16 %v1424_v41, %v1424_v41  ;;  %1624 = vadd.xlane.f32.xlu2 %v1604_v39 }
 0x2f9   : > { %v1571_v44 = vunpack.c.l.bf16 %v1555_v30  ;;  %v1475_v45 = vunpack.c.l.bf16 %v1455_v43 }
 0x2fb   : > { %v1492_v15 = vadd.f32 %v2680_v23, %v1475_v45  ;;  %v1588_v33 = vmul.f32 %v2686_v51, %v1571_v44 }
 0x2fd   : > { %v1540_v46 = vmax.f32 %v1492_v15, 0.0  ;;  %v1605_v47 = vadd.f32 %v2691_v54, %v1588_v33 }
 0x2fe   : > { %v1426_v48 = vpop.f32.mrf.mxu2 }
 0x2ff   : > { %v1556_v62 = vpack.c.bf16 %v1540_v46, %v1540_v46  ;;  %v1456_v49 = vpack.c.bf16 %v1426_v48, %v1426_v48  ;;  %1626 = vadd.xlane.f32.xlu0 %v1605_v47 }
 0x301   : > { %v1572_v10 = vunpack.c.l.bf16 %v1556_v62  ;;  %v1476_v40 = vunpack.c.l.bf16 %v1456_v49 }
 0x303   : > { %v1493_v42 = vadd.f32 %v2680_v23, %v1476_v40  ;;  %v1589_v35 = vmul.f32 %v2686_v51, %v1572_v10 }
 0x305   : > { %v1541_v18 = vmax.f32 %v1493_v42, 0.0  ;;  %v1606_v50 = vadd.f32 %v2691_v54, %v1589_v35 }
 0x306   : > { %v1429_v57 = vpop.f32.mrf.mxu2 }
 0x307   : > { %v1557_v52 = vpack.c.bf16 %v1541_v18, %v1541_v18  ;;  %v1457_v53 = vpack.c.bf16 %v1429_v57, %v1429_v57  ;;  %1628 = vadd.xlane.f32.xlu1 %v1606_v50 }
 0x309   : > { %v1573_v5 = vunpack.c.l.bf16 %v1557_v52  ;;  %v1477_v55 = vunpack.c.l.bf16 %v1457_v53 }
 0x30b   : > { %v1494_v56 = vadd.f32 %v2680_v23, %v1477_v55  ;;  %v1590_v6 = vmul.f32 %v2686_v51, %v1573_v5 }
 0x30d   : > { %v1542_v58 = vmax.f32 %v1494_v56, 0.0  ;;  %v1607_v59 = vadd.f32 %v2691_v54, %v1590_v6 }
 0x30e   : > { %v1431_v61 = vpop.f32.mrf.mxu2 }
 0x30f   : > { %v1558_v26 = vpack.c.bf16 %v1542_v58, %v1542_v58  ;;  %v1458_v38 = vpack.c.bf16 %v1431_v61, %v1431_v61  ;;  %1630 = vadd.xlane.f32.xlu2 %v1607_v59 }
 0x311   : > { %v1574_v8 = vunpack.c.l.bf16 %v1558_v26  ;;  %v1478_v22 = vunpack.c.l.bf16 %v1458_v38 }
 0x313   : > { %v1495_v63 = vadd.f32 %v2680_v23, %v1478_v22  ;;  %v1591_v0 = vmul.f32 %v2686_v51, %v1574_v8 }
 0x315   : > { %v1543_v9 = vmax.f32 %v1495_v63, 0.0  ;;  %v1608_v1 = vadd.f32 %v2691_v54, %v1591_v0 }
 0x316   : > { %v1434_v2 = vpop.f32.mrf.mxu2 }
 0x317   : > { %v1559_v3 = vpack.c.bf16 %v1543_v9, %v1543_v9  ;;  %v1459_v11 = vpack.c.bf16 %v1434_v2, %v1434_v2  ;;  %1632 = vadd.xlane.f32.xlu0 %v1608_v1 }
 0x319   : > { %v1575_v12 = vunpack.c.l.bf16 %v1559_v3  ;;  %v1479_v13 = vunpack.c.l.bf16 %v1459_v11 }
 0x31b   : > { %v1496_v14 = vadd.f32 %v2680_v23, %v1479_v13  ;;  %v1592_v25 = vmul.f32 %v2686_v51, %v1575_v12 }
 0x31d   : > { %v1544_v16 = vmax.f32 %v1496_v14, 0.0  ;;  %v1609_v24 = vadd.f32 %v2691_v54, %v1592_v25 }
 0x31e   : > { %v1436_v17 = vpop.f32.mrf.mxu2 }
 0x31f   : > { %v1560_v7 = vpack.c.bf16 %v1544_v16, %v1544_v16  ;;  %v1460_v19 = vpack.c.bf16 %v1436_v17, %v1436_v17  ;;  %1634 = vadd.xlane.f32.xlu1 %v1609_v24 }
 0x321   : > { %v1576_v20 = vunpack.c.l.bf16 %v1560_v7  ;;  %v1480_v21 = vunpack.c.l.bf16 %v1460_v19 }
 0x323   : > { %v1497_v27 = vadd.f32 %v2680_v23, %v1480_v21  ;;  %v1593_v28 = vmul.f32 %v2686_v51, %v1576_v20 }
 0x325   : > { %v1545_v29 = vmax.f32 %v1497_v27, 0.0  ;;  %v1610_v31 = vadd.f32 %v2691_v54, %v1593_v28 }
 0x326   : > { %v1439_v32 = vpop.f32.mrf.mxu2 }
 0x327   : > { %v1561_v34 = vpack.c.bf16 %v1545_v29, %v1545_v29  ;;  %v1461_v36 = vpack.c.bf16 %v1439_v32, %v1439_v32  ;;  %1636 = vadd.xlane.f32.xlu2 %v1610_v31 }
 0x329   : > { %v1577_v37 = vunpack.c.l.bf16 %v1561_v34  ;;  %v1481_v60 = vunpack.c.l.bf16 %v1461_v36 }
 0x32b   : > { %v1498_v4 = vadd.f32 %v2680_v23, %v1481_v60  ;;  %v1594_v39 = vmul.f32 %v2686_v51, %v1577_v37 }
 0x32d   : > { %v1546_v41 = vmax.f32 %v1498_v4, 0.0  ;;  %v1611_v30 = vadd.f32 %v2691_v54, %v1594_v39 }
 0x32e   : > { %v1441_v43 = vpop.f32.mrf.mxu2 }
 0x32f   : > { %v1562_v44 = vpack.c.bf16 %v1546_v41, %v1546_v41  ;;  %v1462_v45 = vpack.c.bf16 %v1441_v43, %v1441_v43  ;;  %1638 = vadd.xlane.f32.xlu0 %v1611_v30 }
 0x331   : > { %v1578_v15 = vunpack.c.l.bf16 %v1562_v44  ;;  %v1482_v33 = vunpack.c.l.bf16 %v1462_v45 }
 0x333   : > { %v1499_v46 = vadd.f32 %v2680_v23, %v1482_v33  ;;  %v1595_v47 = vmul.f32 %v2686_v51, %v1578_v15 }
 0x335   : > { %v1547_v48 = vmax.f32 %v1499_v46, 0.0  ;;  %v1612_v62 = vadd.f32 %v2691_v54, %v1595_v47 }
 0x336   : > { %v1444_v49 = vpop.f32.mrf.mxu2 }
 0x337   : > { %v1563_v10 = vpack.c.bf16 %v1547_v48, %v1547_v48  ;;  %v1463_v40 = vpack.c.bf16 %v1444_v49, %v1444_v49  ;;  %1640 = vadd.xlane.f32.xlu1 %v1612_v62 }
 0x339   : > { %v1579_v42 = vunpack.c.l.bf16 %v1563_v10  ;;  %v1483_v35 = vunpack.c.l.bf16 %v1463_v40 }
 0x33b   : > { %v1500_v18 = vadd.f32 %v2680_v23, %v1483_v35  ;;  %v1596_v50 = vmul.f32 %v2686_v51, %v1579_v42 }
 0x33d   : > { %v1548_v57 = vmax.f32 %v1500_v18, 0.0  ;;  %v1613_v52 = vadd.f32 %v2691_v54, %v1596_v50 }
 0x33e   : > { %v1446_v53 = vpop.f32.mrf.mxu2 }
 0x33f   : > { %v1564_v5 = vpack.c.bf16 %v1548_v57, %v1548_v57  ;;  %v1464_v55 = vpack.c.bf16 %v1446_v53, %v1446_v53  ;;  %1642 = vadd.xlane.f32.xlu2 %v1613_v52 }
 0x341   : > { %v1580_v56 = vunpack.c.l.bf16 %v1564_v5  ;;  %v1484_v6 = vunpack.c.l.bf16 %v1464_v55 }
 0x343   : > { %v1501_v58 = vadd.f32 %v2680_v23, %v1484_v6  ;;  %v1597_v59 = vmul.f32 %v2686_v51, %v1580_v56  ;;  %v1664_v23 = vlaneseq }
 0x345   : > { %v1549_v61 = vmax.f32 %v1501_v58, 0.0  ;;  %v1614_v26 = vadd.f32 %v2691_v54, %v1597_v59  ;;  %v1665_v14 = vand.u32 127, %v1664_v23 }
 0x347   : > { %v1565_v38 = vpack.c.bf16 %v1549_v61, %v1549_v61  ;;  %1644 = vadd.xlane.f32.xlu0 %v1614_v26  ;;  %v1667_v16 = vadd.s32 4294967288, %v1665_v14  ;;  %v1671_v24 = vadd.s32 4294967280, %v1665_v14  ;;  %v1675_v17 = vadd.s32 4294967272, %v1665_v14 }
 0x348   : > { %v1679_v7 = vadd.s32 4294967264, %v1665_v14  ;;  %v1683_v20 = vadd.s32 4294967256, %v1665_v14  ;;  %v1687_v21 = vadd.s32 4294967248, %v1665_v14  ;;  %v1691_v31 = vadd.s32 4294967240, %v1665_v14 }
 0x349   : > { %v1581_v8 = vunpack.c.l.bf16 %v1565_v38  ;;  %v1695_v36 = vadd.s32 4294967232, %v1665_v14  ;;  %v1699_v4 = vadd.s32 4294967224, %v1665_v14  ;;  %v1703_v30 = vadd.s32 4294967216, %v1665_v14 }
 0x34a   : > { %v1617_v0 = vpop.xlane.xlu2 %1616  ;;  %v1707_v45 = vadd.s32 4294967208, %v1665_v14  ;;  %v1711_v46 = vadd.s32 4294967200, %v1665_v14  ;;  %v1715_v49 = vadd.s32 4294967192, %v1665_v14  ;;  %v1719_v35 = vadd.s32 4294967184, %v1665_v14 }
 0x34b   : > { %v1598_v22 = vmul.f32 %v2686_v51, %v1581_v8  ;;  %v1666_v28 = vperm.slane %v1617_v0, %v1665_v14  ;;  %v1723_v56 = vadd.s32 4294967176, %v1665_v14 }
 0x34d   : > { %v1615_v63 = vadd.f32 %v2691_v54, %v1598_v22 }
 0x34f   : > { %1646 = vadd.xlane.f32.xlu1 %v1615_v63 }
 0x352   : > { %v1619_v1 = vpop.xlane.xlu0 %1618 }
 0x353   : > { %v1668_v51 = vperm.slane %v1619_v1, %v1667_v16 }
 0x355   : > { %v1670_v37 = vsel %vm1669_vm0, %v1668_v51, %v1666_v28 }
 0x35a   : > { %v1621_v2 = vpop.xlane.xlu1 %1620 }
 0x35b   : > { %v1672_v54 = vperm.slane %v1621_v2, %v1671_v24 }
 0x35d   : > { %v1674_v39 = vsel %vm1673_vm1, %v1672_v54, %v1670_v37 }
 0x362   : > { %v1623_v9 = vpop.xlane.xlu2 %1622 }
 0x363   : > { %v1676_v29 = vperm.slane %v1623_v9, %v1675_v17 }
 0x365   : > { %v1678_v43 = vsel %vm1677_vm2, %v1676_v29, %v1674_v39 }
 0x36a   : > { %v1625_v3 = vpop.xlane.xlu2 %1624 }
 0x36b   : > { %v1680_v34 = vperm.slane %v1625_v3, %v1679_v7 }
 0x36d   : > { %v1682_v15 = vsel %vm1681_vm3, %v1680_v34, %v1678_v43 }
 0x372   : > { %v1627_v11 = vpop.xlane.xlu0 %1626 }
 0x373   : > { %v1684_v60 = vperm.slane %v1627_v11, %v1683_v20 }
 0x375   : > { %v1686_v48 = vsel %vm1685_vm4, %v1684_v60, %v1682_v15 }
 0x37a   : > { %v1629_v12 = vpop.xlane.xlu1 %1628 }
 0x37b   : > { %v1688_v41 = vperm.slane %v1629_v12, %v1687_v21 }
 0x37d   : > { %v1690_v10 = vsel %vm1689_vm5, %v1688_v41, %v1686_v48 }
 0x382   : > { %v1631_v13 = vpop.xlane.xlu2 %1630 }
 0x383   : > { %v1692_v44 = vperm.slane %v1631_v13, %v1691_v31 }
 0x385   : > { %v1694_v18 = vsel %vm1693_vm6, %v1692_v44, %v1690_v10 }
 0x38a   : > { %v1633_v25 = vpop.xlane.xlu0 %1632 }
 0x38b   : > { %v1696_v33 = vperm.slane %v1633_v25, %v1695_v36 }
 0x38d   : > { %v1698_v52 = vsel %vm1697_vm7, %v1696_v33, %v1694_v18 }
 0x392   : > { %v1635_v19 = vpop.xlane.xlu1 %1634 }
 0x393   : > { %v1700_v62 = vperm.slane %v1635_v19, %v1699_v4 }
 0x395   : > { %v1702_v5 = vsel %vm1701_vm8, %v1700_v62, %v1698_v52 }
 0x39a   : > { %v1637_v27 = vpop.xlane.xlu2 %1636 }
 0x39b   : > { %v1704_v40 = vperm.slane %v1637_v27, %v1703_v30 }
 0x39d   : > { %v1706_v6 = vsel %vm1705_vm9, %v1704_v40, %v1702_v5 }
 0x3a2   : > { %v1639_v32 = vpop.xlane.xlu0 %1638 }
 0x3a3   : > { %v1708_v50 = vperm.slane %v1639_v32, %v1707_v45 }
 0x3a5   : > { %v1710_v59 = vsel %vm1709_vm10, %v1708_v50, %v1706_v6 }
 0x3aa   : > { %v1641_v47 = vpop.xlane.xlu1 %1640 }
 0x3ab   : > { %v1712_v53 = vperm.slane %v1641_v47, %v1711_v46 }
 0x3ad   : > { %v1714_v61 = vsel %vm1713_vm11, %v1712_v53, %v1710_v59 }
 0x3b2   : > { %v1643_v42 = vpop.xlane.xlu2 %1642 }
 0x3b3   : > { %v1716_v55 = vperm.slane %v1643_v42, %v1715_v49 }
 0x3b5   : > { %v1718_v38 = vsel %vm1717_vm12, %v1716_v55, %v1714_v61 }
 0x3ba   : > { %v1645_v57 = vpop.xlane.xlu0 %1644 }
 0x3bb   : > { %v1720_v58 = vperm.slane %v1645_v57, %v1719_v35 }
 0x3bd   : > { %v1722_v22 = vsel %vm1721_vm13, %v1720_v58, %v1718_v38 }
 0x3c2   : > { %v1647_v26 = vpop.xlane.xlu1 %1646 }
 0x3c3   : > { %v1724_v8 = vperm.slane %v1647_v26, %v1723_v56 }
 0x3c5   : > { %v1726_v63 = vsel %vm1725_vm14, %v1724_v8, %v1722_v22 }
 0x3c6   : > { %1728 = vst [vmem:[%s451_s29] sm:$0x1] %v1726_v63 }
 0x3c7 PF: > { %s22_s30 = sadd.s32 1, %s2353_s30  }
 0x3c8   : > { %p19_p7 = scmp.ge.s32.totalorder %s22_s30, 4  }
 0x3ca   :  { %21 = sbr.rel (!%p19_p7) target bundleno = 3 (0x3), region = 113 }
 0x3cf   :  { %1746 = vsyncpa [#allocation3], 1 }
 0x3d0   :  { %1748 = vsyncpa [#allocation3 + $0x1], 1 }
 0x3d1   :  { %1749 = vsyncpa [#allocation5], 1 }
 0x3d2   :  { %1750 = vsyncpa [#allocation8], 1 }

</bundles_post_ra>
